<compile_context>
chip_gen: v5e
topology: v5e:2x2
jax: 0.10.0
libtpu: 0.0.40
codegen_flags: <defaults>
</compile_context>

<pallas_src>
import functools

import numpy as np

import jax
import jax.numpy as jnp
from jax.experimental import pallas as pl
from jax.experimental.pallas import tpu as pltpu

_EPS = 1e-5


# ----------------------------------------------------------------------------
# Fused Pallas kernel: whole LetterRec forward for a tile of B images per step.
# ----------------------------------------------------------------------------
def letter_rec_kernel(x_ref, w1_ref, b1_ref, w2_ref, b2_ref, w3_ref, b3_ref,
                      w4_ref, b4_ref, o_ref, y1_ref, x2_ref, y2_ref, p2_ref,
                      *, B):
    f32 = jnp.float32
    R1 = B * 16      # conv1 output rows in this block (16 per image)
    R2 = B * 8       # pooled1 / conv2 output rows (8 per image)
    R3 = B * 4       # pooled2 rows (4 per image)

    # ---- Conv1(4->8,k3,p1) + BN2d + ReLU: 3 banded GEMMs on the stacked rows.
    # x_ref: (B*16 + 2, 72); rows 1..B*16 hold real image rows (image n row h
    # at index n*16+h+1), rows 0 / B*16+1 are block-boundary zeros.  Tap ky of
    # output row s reads block row s+ky; the ky=0 / ky=2 taps are masked where
    # they would cross an image boundary (height zero-padding).
    ridx1 = jax.lax.broadcasted_iota(jnp.int32, (R1, 1), 0) & 15
    lhs0 = jnp.where(ridx1 != 0, x_ref[0:R1, :], 0.0)
    lhs2 = jnp.where(ridx1 != 15, x_ref[2:R1 + 2, :], 0.0)
    acc = jnp.dot(lhs0, w1_ref[0], preferred_element_type=f32)
    acc += jnp.dot(x_ref[1:R1 + 1, :], w1_ref[1], preferred_element_type=f32)
    acc += jnp.dot(lhs2, w1_ref[2], preferred_element_type=f32)
    # Output layout: col = (w % 2)*64 + (w // 2)*8 + cout  (even/odd width
    # split so the width max-pool below is a contiguous half compare).
    y1_ref[...] = jnp.maximum(acc + b1_ref[...], 0.0)            # (B*16, 128)

    # ---- MaxPool 2x2/2: height via stride-2 sublane reads (16 rows/image is
    # even, so pairs never cross images), width via halves.
    r = jnp.maximum(y1_ref[pl.ds(0, R2, 2), :], y1_ref[pl.ds(1, R2, 2), :])
    pooled1 = jnp.maximum(r[:, 0:64], r[:, 64:128])              # (B*8, 64)

    # ---- Stage pooled map with boundary zero rows for conv2's height padding
    #      (width padding is folded into the conv2 band weights).
    x2_ref[...] = jnp.zeros((R2 + 2, 64), f32)
    x2_ref[1:R2 + 1, :] = pooled1

    # ---- Conv2(8->4,k3,p1) + BN2d + ReLU (same banded-GEMM + mask scheme).
    ridx2 = jax.lax.broadcasted_iota(jnp.int32, (R2, 1), 0) & 7
    lhs0 = jnp.where(ridx2 != 0, x2_ref[0:R2, :], 0.0)
    lhs2 = jnp.where(ridx2 != 7, x2_ref[2:R2 + 2, :], 0.0)
    acc = jnp.dot(lhs0, w2_ref[0], preferred_element_type=f32)
    acc += jnp.dot(x2_ref[1:R2 + 1, :], w2_ref[1], preferred_element_type=f32)
    acc += jnp.dot(lhs2, w2_ref[2], preferred_element_type=f32)
    # Output layout: col = (w % 2)*16 + (w // 2)*4 + cout.
    y2_ref[...] = jnp.maximum(acc + b2_ref[...], 0.0)            # (B*8, 32)

    # ---- MaxPool 2x2/2.
    r = jnp.maximum(y2_ref[pl.ds(0, R3, 2), :], y2_ref[pl.ds(1, R3, 2), :])
    p2_ref[...] = jnp.maximum(r[:, 0:16], r[:, 16:32])           # (B*4, 16) col = w*4 + c

    # ---- Linear(64,32) + BN1d + ReLU, batched across the image tile.
    # Image n's 4 pooled rows sit at indices n*4+h -> gather each h with a
    # stride-4 sublane read; NCHW flatten is folded into w3.
    acc = jnp.zeros((B, 32), f32)
    for h in range(4):
        acc += jnp.dot(p2_ref[pl.ds(h, B, 4), :], w3_ref[h],
                       preferred_element_type=f32)
    hidden = jnp.maximum(acc + b3_ref[...], 0.0)                 # (B, 32)
    # TODO(synk): training-mode Dropout(p=0.8) RNG masking not implemented
    # (eval-mode identity, matching inference semantics).

    # ---- Final Linear(32,10).
    o_ref[...] = jnp.dot(hidden, w4_ref[...],
                         preferred_element_type=f32) + b4_ref[...]   # (B, 10)


# ----------------------------------------------------------------------------
# Host-side parameter preparation (runs once): fold BN into weights/biases and
# build the banded GEMM matrices that encode conv taps, width padding, pooling
# layout and the NCHW flatten.
# ----------------------------------------------------------------------------
def _bn_fold(gamma, beta, mean, var, bias):
    gamma, beta, mean, var, bias = (
        np.asarray(a, np.float32) for a in (gamma, beta, mean, var, bias))
    scale = gamma / np.sqrt(var + _EPS)
    return scale, beta + scale * (bias - mean)


def _conv1_band(w, scale):
    """w: (8,4,3,3) OIHW -> (3, 72, 128) band weights (BN scale folded in)."""
    w = np.asarray(w, np.float32)
    Cout, Cin, K, Wout, half = 8, 4, 3, 16, 64
    out = np.zeros((K, 18 * Cin, 2 * half), np.float32)
    for ky in range(K):
        for wo in range(Wout):
            col0 = (wo % 2) * half + (wo // 2) * Cout
            for kx in range(K):
                wp = wo + kx                       # padded input column (0..17)
                for ci in range(Cin):
                    out[ky, wp * Cin + ci, col0:col0 + Cout] = w[:, ci, ky, kx] * scale
    return out


def _conv2_band(w, scale):
    """w: (4,8,3,3) OIHW -> (3, 64, 32) band weights; width zero-pad omitted."""
    w = np.asarray(w, np.float32)
    Cout, Cin, K, Wout, Win, half = 4, 8, 3, 8, 8, 16
    out = np.zeros((K, Win * Cin, 2 * half), np.float32)
    for ky in range(K):
        for wo in range(Wout):
            col0 = (wo % 2) * half + (wo // 2) * Cout
            for kx in range(K):
                wi = wo + kx - 1                   # unpadded input column
                if wi < 0 or wi >= Win:
                    continue                       # zero padding -> no term
                for ci in range(Cin):
                    out[ky, wi * Cin + ci, col0:col0 + Cout] = w[:, ci, ky, kx] * scale
    return out


def _fc1_band(w, scale):
    """w: (32,64), torch NCHW flatten f = c*16 + h*4 + wv -> (4, 16, 32)."""
    w = np.asarray(w, np.float32)
    out = np.zeros((4, 16, 32), np.float32)
    for h in range(4):
        for wv in range(4):
            for c in range(4):
                out[h, wv * 4 + c, :] = w[:, c * 16 + h * 4 + wv] * scale
    return out


def prepare_params(p):
    s1, b1 = _bn_fold(p["bn1_g"], p["bn1_b"], p["bn1_m"], p["bn1_v"], p["conv1_b"])
    s2, b2 = _bn_fold(p["bn2_g"], p["bn2_b"], p["bn2_m"], p["bn2_v"], p["conv2_b"])
    s3, b3 = _bn_fold(p["bn3_g"], p["bn3_b"], p["bn3_m"], p["bn3_v"], p["fc1_b"])
    kp = {
        "w1": _conv1_band(p["conv1_w"], s1),
        "b1": np.tile(b1, 16).reshape(1, 128),
        "w2": _conv2_band(p["conv2_w"], s2),
        "b2": np.tile(b2, 8).reshape(1, 32),
        "w3": _fc1_band(p["fc1_w"], s3),
        "b3": b3.reshape(1, 32),
        "w4": np.asarray(p["fc2_w"], np.float32).T.copy(),
        "b4": np.asarray(p["fc2_b"], np.float32).reshape(1, 10),
    }
    return {k: jnp.asarray(v) for k, v in kp.items()}


# ----------------------------------------------------------------------------
# Forward: one fused pallas_call, grid over batch tiles ("parallel" on v7x).
# ----------------------------------------------------------------------------
@functools.partial(jax.jit, static_argnames=("batch_tile",))
def letter_rec_forward(kp, x_nchw, batch_tile=8):
    N = x_nchw.shape[0]
    B = batch_tile
    G = pl.cdiv(N, B)
    N_pad = G * B

    x = jnp.transpose(x_nchw.astype(jnp.float32), (0, 2, 3, 1))      # NCHW -> NHWC
    x = jnp.pad(x, ((0, N_pad - N), (0, 0), (1, 1), (0, 0)))         # batch + width pad
    x = x.reshape(G, B * 16, 72)                                     # rows = n*16 + h
    x = jnp.pad(x, ((0, 0), (1, 1), (0, 0)))                         # block boundary rows

    kernel = functools.partial(letter_rec_kernel, B=B)
    out = pl.pallas_call(
        kernel,
        out_shape=jax.ShapeDtypeStruct((N_pad, 10), jnp.float32),
        grid=(G,),
        in_specs=[
            pl.BlockSpec((None, B * 16 + 2, 72), lambda g: (g, 0, 0)),  # image-row stack
            pl.BlockSpec((3, 72, 128), lambda g: (0, 0, 0)),            # conv1 bands
            pl.BlockSpec((1, 128), lambda g: (0, 0)),                   # conv1 bias
            pl.BlockSpec((3, 64, 32), lambda g: (0, 0, 0)),             # conv2 bands
            pl.BlockSpec((1, 32), lambda g: (0, 0)),                    # conv2 bias
            pl.BlockSpec((4, 16, 32), lambda g: (0, 0, 0)),             # fc1 (per pooled row)
            pl.BlockSpec((1, 32), lambda g: (0, 0)),                    # fc1 bias
            pl.BlockSpec((32, 10), lambda g: (0, 0)),                   # fc2 weight
            pl.BlockSpec((1, 10), lambda g: (0, 0)),                    # fc2 bias
        ],
        out_specs=pl.BlockSpec((B, 10), lambda g: (g, 0)),
        scratch_shapes=[
            pltpu.VMEM((B * 16, 128), jnp.float32),   # conv1 output (pool staging)
            pltpu.VMEM((B * 8 + 2, 64), jnp.float32),  # pooled1, height-pad staged for conv2
            pltpu.VMEM((B * 8, 32), jnp.float32),      # conv2 output (pool staging)
            pltpu.VMEM((B * 4, 16), jnp.float32),      # pooled2 (fc1 stride-4 gathers)
        ],
        compiler_params=pltpu.CompilerParams(
            dimension_semantics=("parallel",)),
    )(x, kp["w1"], kp["b1"], kp["w2"], kp["b2"],
      kp["w3"], kp["b3"], kp["w4"], kp["b4"])
    return out[:N]


# ----------------------------------------------------------------------------
# Parameters & pure-JAX reference (for a correctness check).
# ----------------------------------------------------------------------------
def init_params(key):
    ks = jax.random.split(key, 20)
    n = lambda k, s, sc=0.1: (sc * jax.random.normal(k, s)).astype(jnp.float32)
    u = lambda k, s: 1.0 + 0.1 * jax.random.uniform(k, s, dtype=jnp.float32)
    return {
        # conv block 1 (up): Conv2d(4->8,3,1,1) + BN2d(8)
        "conv1_w": n(ks[0], (8, 4, 3, 3)), "conv1_b": n(ks[1], (8,)),
        "bn1_g": 1.0 + n(ks[2], (8,)), "bn1_b": n(ks[3], (8,)),
        "bn1_m": n(ks[4], (8,)), "bn1_v": u(ks[5], (8,)),
        # conv block 2 (down): Conv2d(8->4,3,1,1) + BN2d(4)
        "conv2_w": n(ks[6], (4, 8, 3, 3)), "conv2_b": n(ks[7], (4,)),
        "bn2_g": 1.0 + n(ks[8], (4,)), "bn2_b": n(ks[9], (4,)),
        "bn2_m": n(ks[10], (4,)), "bn2_v": u(ks[11], (4,)),
        # classifier: Linear(64,32) + BN1d(32); final Linear(32,10)
        "fc1_w": n(ks[12], (32, 64)), "fc1_b": n(ks[13], (32,)),
        "bn3_g": 1.0 + n(ks[14], (32,)), "bn3_b": n(ks[15], (32,)),
        "bn3_m": n(ks[16], (32,)), "bn3_v": u(ks[17], (32,)),
        "fc2_w": n(ks[18], (10, 32)), "fc2_b": n(ks[19], (10,)),
    }


@jax.jit
def reference_forward(p, x_nchw):
    def conv_bn_relu(x, w, b, g, bt, m, v):
        y = jax.lax.conv_general_dilated(
            x, w, (1, 1), ((1, 1), (1, 1)),
            dimension_numbers=("NCHW", "OIHW", "NCHW"))
        y = y + b[None, :, None, None]
        s = g / jnp.sqrt(v + _EPS)
        return jnp.maximum(
            s[None, :, None, None] * (y - m[None, :, None, None])
            + bt[None, :, None, None], 0.0)

    def pool(x):
        N, C, H, W = x.shape
        return x.reshape(N, C, H // 2, 2, W // 2, 2).max(axis=(3, 5))

    x = x_nchw.astype(jnp.float32)
    x = pool(conv_bn_relu(x, p["conv1_w"], p["conv1_b"],
                          p["bn1_g"], p["bn1_b"], p["bn1_m"], p["bn1_v"]))
    x = pool(conv_bn_relu(x, p["conv2_w"], p["conv2_b"],
                          p["bn2_g"], p["bn2_b"], p["bn2_m"], p["bn2_v"]))
    x = x.reshape(x.shape[0], -1)                                  # NCHW flatten
    z = x @ p["fc1_w"].T + p["fc1_b"]
    s = p["bn3_g"] / jnp.sqrt(p["bn3_v"] + _EPS)
    z = jnp.maximum(s * (z - p["bn3_m"]) + p["bn3_b"], 0.0)        # Dropout=identity
    return z @ p["fc2_w"].T + p["fc2_b"]


if __name__ == "__main__":
    key = jax.random.PRNGKey(0)
    pkey, xkey = jax.random.split(key)
    params = init_params(pkey)
    kparams = prepare_params(params)
    x = jax.random.normal(xkey, (2, 4, 16, 16), dtype=jnp.float32)  # NCHW like torch

    out = letter_rec_forward(kparams, x)
    jax.block_until_ready(out)
    assert out.shape == (2, 10) and out.dtype == jnp.float32

    ref = reference_forward(params, x)
    np.testing.assert_allclose(np.asarray(out), np.asarray(ref),
                               rtol=1e-2, atol=1e-2)
    print("KERNEL_OK")
</pallas_src>

<mosaic_0001>
module attributes {stable_mosaic.version = 11 : i64} {
  func.func @letter_rec_kernel(%arg0: i32, %arg1: memref<1x130x72xf32, #tpu.memory_space<vmem>>, %arg2: memref<3x72x128xf32, #tpu.memory_space<vmem>>, %arg3: memref<1x128xf32, #tpu.memory_space<vmem>>, %arg4: memref<3x64x32xf32, #tpu.memory_space<vmem>>, %arg5: memref<1x32xf32, #tpu.memory_space<vmem>>, %arg6: memref<4x16x32xf32, #tpu.memory_space<vmem>>, %arg7: memref<1x32xf32, #tpu.memory_space<vmem>>, %arg8: memref<32x10xf32, #tpu.memory_space<vmem>>, %arg9: memref<1x10xf32, #tpu.memory_space<vmem>>, %arg10: memref<8x10xf32, #tpu.memory_space<vmem>>, %arg11: memref<128x128xf32, #tpu.memory_space<vmem>>, %arg12: memref<66x64xf32, #tpu.memory_space<vmem>>, %arg13: memref<64x32xf32, #tpu.memory_space<vmem>>, %arg14: memref<32x16xf32, #tpu.memory_space<vmem>>) attributes {dimension_semantics = [#tpu.dimension_semantics<parallel>], iteration_bounds = array<i64: 1>, scalar_prefetch = 0 : i64, scratch_operands = 4 : i64, tpu.core_type = #tpu.core_type<tc>, window_params = [{transform_indices = @transform_0, window_bounds = array<i64: 1, 130, 72>}, {pipeline_mode = #tpu.pipeline_mode<synchronous>, transform_indices = @transform_1, window_bounds = array<i64: 3, 72, 128>}, {pipeline_mode = #tpu.pipeline_mode<synchronous>, transform_indices = @transform_2, window_bounds = array<i64: 1, 128>}, {pipeline_mode = #tpu.pipeline_mode<synchronous>, transform_indices = @transform_3, window_bounds = array<i64: 3, 64, 32>}, {pipeline_mode = #tpu.pipeline_mode<synchronous>, transform_indices = @transform_4, window_bounds = array<i64: 1, 32>}, {pipeline_mode = #tpu.pipeline_mode<synchronous>, transform_indices = @transform_5, window_bounds = array<i64: 4, 16, 32>}, {pipeline_mode = #tpu.pipeline_mode<synchronous>, transform_indices = @transform_6, window_bounds = array<i64: 1, 32>}, {pipeline_mode = #tpu.pipeline_mode<synchronous>, transform_indices = @transform_7, window_bounds = array<i64: 32, 10>}, {pipeline_mode = #tpu.pipeline_mode<synchronous>, transform_indices = @transform_8, window_bounds = array<i64: 1, 10>}, {transform_indices = @transform_9, window_bounds = array<i64: 8, 10>}]} {
    %0 = tpu.iota {dimensions = array<i32: 0>} : vector<128x1xi32>
    %c15_i32 = arith.constant 15 : i32
    %1 = vector.broadcast %c15_i32 : i32 to vector<128x1xi32>
    %2 = arith.andi %0, %1 : vector<128x1xi32>
    %c0_i32 = arith.constant 0 : i32
    %3 = vector.broadcast %c0_i32 : i32 to vector<128x1xi32>
    %4 = arith.cmpi ne, %2, %3 : vector<128x1xi32>
    %c0 = arith.constant 0 : index
    %c0_0 = arith.constant 0 : index
    %c0_1 = arith.constant 0 : index
    %5 = vector.load %arg1[%c0, %c0_0, %c0_1] : memref<1x130x72xf32, #tpu.memory_space<vmem>>, vector<1x128x72xf32>
    %6 = vector.shape_cast %5 : vector<1x128x72xf32> to vector<128x72xf32>
    %cst = arith.constant 0.000000e+00 : f32
    %7 = vector.shape_cast %4 : vector<128x1xi1> to vector<128x1xi1>
    %8 = vector.broadcast %7 : vector<128x1xi1> to vector<128x72xi1>
    %9 = vector.broadcast %cst : f32 to vector<128x72xf32>
    %10 = arith.select %8, %6, %9 : vector<128x72xi1>, vector<128x72xf32>
    %c15_i32_2 = arith.constant 15 : i32
    %11 = vector.broadcast %c15_i32_2 : i32 to vector<128x1xi32>
    %12 = arith.cmpi ne, %2, %11 : vector<128x1xi32>
    %c0_3 = arith.constant 0 : index
    %c2 = arith.constant 2 : index
    %c0_4 = arith.constant 0 : index
    %13 = vector.load %arg1[%c0_3, %c2, %c0_4] : memref<1x130x72xf32, #tpu.memory_space<vmem>>, vector<1x128x72xf32>
    %14 = vector.shape_cast %13 : vector<1x128x72xf32> to vector<128x72xf32>
    %cst_5 = arith.constant 0.000000e+00 : f32
    %15 = vector.shape_cast %12 : vector<128x1xi1> to vector<128x1xi1>
    %16 = vector.broadcast %15 : vector<128x1xi1> to vector<128x72xi1>
    %17 = vector.broadcast %cst_5 : f32 to vector<128x72xf32>
    %18 = arith.select %16, %14, %17 : vector<128x72xi1>, vector<128x72xf32>
    %c0_6 = arith.constant 0 : index
    %c0_7 = arith.constant 0 : index
    %c0_8 = arith.constant 0 : index
    %19 = vector.load %arg2[%c0_6, %c0_7, %c0_8] : memref<3x72x128xf32, #tpu.memory_space<vmem>>, vector<1x72x128xf32>
    %20 = vector.shape_cast %19 : vector<1x72x128xf32> to vector<72x128xf32>
    %cst_9 = arith.constant dense<0.000000e+00> : vector<128x128xf32>
    %21 = tpu.matmul %10, %20, %cst_9 {dimension_numbers = #tpu.dot_dimension_numbers<[1], [0], [0], [1], [0, 0, 1, 1], [], []>} : vector<128x72xf32>, vector<72x128xf32>, vector<128x128xf32> -> vector<128x128xf32>
    %c0_10 = arith.constant 0 : index
    %c1 = arith.constant 1 : index
    %c0_11 = arith.constant 0 : index
    %22 = vector.load %arg1[%c0_10, %c1, %c0_11] : memref<1x130x72xf32, #tpu.memory_space<vmem>>, vector<1x128x72xf32>
    %23 = vector.shape_cast %22 : vector<1x128x72xf32> to vector<128x72xf32>
    %c1_12 = arith.constant 1 : index
    %c0_13 = arith.constant 0 : index
    %c0_14 = arith.constant 0 : index
    %24 = vector.load %arg2[%c1_12, %c0_13, %c0_14] : memref<3x72x128xf32, #tpu.memory_space<vmem>>, vector<1x72x128xf32>
    %25 = vector.shape_cast %24 : vector<1x72x128xf32> to vector<72x128xf32>
    %cst_15 = arith.constant dense<0.000000e+00> : vector<128x128xf32>
    %26 = tpu.matmul %23, %25, %cst_15 {dimension_numbers = #tpu.dot_dimension_numbers<[1], [0], [0], [1], [0, 0, 1, 1], [], []>} : vector<128x72xf32>, vector<72x128xf32>, vector<128x128xf32> -> vector<128x128xf32>
    %27 = arith.addf %21, %26 : vector<128x128xf32>
    %c2_16 = arith.constant 2 : index
    %c0_17 = arith.constant 0 : index
    %c0_18 = arith.constant 0 : index
    %28 = vector.load %arg2[%c2_16, %c0_17, %c0_18] : memref<3x72x128xf32, #tpu.memory_space<vmem>>, vector<1x72x128xf32>
    %29 = vector.shape_cast %28 : vector<1x72x128xf32> to vector<72x128xf32>
    %cst_19 = arith.constant dense<0.000000e+00> : vector<128x128xf32>
    %30 = tpu.matmul %18, %29, %cst_19 {dimension_numbers = #tpu.dot_dimension_numbers<[1], [0], [0], [1], [0, 0, 1, 1], [], []>} : vector<128x72xf32>, vector<72x128xf32>, vector<128x128xf32> -> vector<128x128xf32>
    %31 = arith.addf %27, %30 : vector<128x128xf32>
    %c0_20 = arith.constant 0 : index
    %c0_21 = arith.constant 0 : index
    %32 = vector.load %arg3[%c0_20, %c0_21] : memref<1x128xf32, #tpu.memory_space<vmem>>, vector<1x128xf32>
    %33 = vector.broadcast %32 : vector<1x128xf32> to vector<128x128xf32>
    %34 = arith.addf %31, %33 : vector<128x128xf32>
    %cst_22 = arith.constant 0.000000e+00 : f32
    %35 = vector.broadcast %cst_22 : f32 to vector<128x128xf32>
    %36 = arith.maximumf %34, %35 : vector<128x128xf32>
    %c0_23 = arith.constant 0 : index
    %c0_24 = arith.constant 0 : index
    %37 = vector.load %arg11[%c0_23, %c0_24] : memref<128x128xf32, #tpu.memory_space<vmem>>, vector<128x128xf32>
    tpu.vector_store %arg11[%c0_23, %c0_24], %36 {strides = array<i32>} : memref<128x128xf32, #tpu.memory_space<vmem>>, vector<128x128xf32>,
    %c0_25 = arith.constant 0 : index
    %c0_26 = arith.constant 0 : index
    %38 = tpu.strided_load %arg11[%c0_25, %c0_26] {strides = array<i32: 2, 1>} : memref<128x128xf32, #tpu.memory_space<vmem>>, vector<64x128xf32>
    %c1_27 = arith.constant 1 : index
    %c0_28 = arith.constant 0 : index
    %39 = tpu.strided_load %arg11[%c1_27, %c0_28] {strides = array<i32: 2, 1>} : memref<128x128xf32, #tpu.memory_space<vmem>>, vector<64x128xf32>
    %40 = arith.maximumf %38, %39 : vector<64x128xf32>
    %41 = vector.extract_strided_slice %40 {offsets = [0, 0], sizes = [64, 64], strides = [1, 1]} : vector<64x128xf32> to vector<64x64xf32>
    %42 = vector.extract_strided_slice %40 {offsets = [0, 64], sizes = [64, 64], strides = [1, 1]} : vector<64x128xf32> to vector<64x64xf32>
    %43 = arith.maximumf %41, %42 : vector<64x64xf32>
    %cst_29 = arith.constant 0.000000e+00 : f32
    %44 = vector.broadcast %cst_29 : f32 to vector<66x64xf32>
    %c0_30 = arith.constant 0 : index
    %c0_31 = arith.constant 0 : index
    %45 = vector.load %arg12[%c0_30, %c0_31] : memref<66x64xf32, #tpu.memory_space<vmem>>, vector<66x64xf32>
    tpu.vector_store %arg12[%c0_30, %c0_31], %44 {strides = array<i32>} : memref<66x64xf32, #tpu.memory_space<vmem>>, vector<66x64xf32>,
    %c1_32 = arith.constant 1 : index
    %c0_33 = arith.constant 0 : index
    %46 = vector.load %arg12[%c1_32, %c0_33] : memref<66x64xf32, #tpu.memory_space<vmem>>, vector<64x64xf32>
    tpu.vector_store %arg12[%c1_32, %c0_33], %43 {strides = array<i32>} : memref<66x64xf32, #tpu.memory_space<vmem>>, vector<64x64xf32>,
    %47 = tpu.iota {dimensions = array<i32: 0>} : vector<64x1xi32>
    %c7_i32 = arith.constant 7 : i32
    %48 = vector.broadcast %c7_i32 : i32 to vector<64x1xi32>
    %49 = arith.andi %47, %48 : vector<64x1xi32>
    %c0_i32_34 = arith.constant 0 : i32
    %50 = vector.broadcast %c0_i32_34 : i32 to vector<64x1xi32>
    %51 = arith.cmpi ne, %49, %50 : vector<64x1xi32>
    %c0_35 = arith.constant 0 : index
    %c0_36 = arith.constant 0 : index
    %52 = vector.load %arg12[%c0_35, %c0_36] : memref<66x64xf32, #tpu.memory_space<vmem>>, vector<64x64xf32>
    %cst_37 = arith.constant 0.000000e+00 : f32
    %53 = vector.shape_cast %51 : vector<64x1xi1> to vector<64x1xi1>
    %54 = vector.broadcast %53 : vector<64x1xi1> to vector<64x64xi1>
    %55 = vector.broadcast %cst_37 : f32 to vector<64x64xf32>
    %56 = arith.select %54, %52, %55 : vector<64x64xi1>, vector<64x64xf32>
    %c7_i32_38 = arith.constant 7 : i32
    %57 = vector.broadcast %c7_i32_38 : i32 to vector<64x1xi32>
    %58 = arith.cmpi ne, %49, %57 : vector<64x1xi32>
    %c2_39 = arith.constant 2 : index
    %c0_40 = arith.constant 0 : index
    %59 = vector.load %arg12[%c2_39, %c0_40] : memref<66x64xf32, #tpu.memory_space<vmem>>, vector<64x64xf32>
    %cst_41 = arith.constant 0.000000e+00 : f32
    %60 = vector.shape_cast %58 : vector<64x1xi1> to vector<64x1xi1>
    %61 = vector.broadcast %60 : vector<64x1xi1> to vector<64x64xi1>
    %62 = vector.broadcast %cst_41 : f32 to vector<64x64xf32>
    %63 = arith.select %61, %59, %62 : vector<64x64xi1>, vector<64x64xf32>
    %c0_42 = arith.constant 0 : index
    %c0_43 = arith.constant 0 : index
    %c0_44 = arith.constant 0 : index
    %64 = vector.load %arg4[%c0_42, %c0_43, %c0_44] : memref<3x64x32xf32, #tpu.memory_space<vmem>>, vector<1x64x32xf32>
    %65 = vector.shape_cast %64 : vector<1x64x32xf32> to vector<64x32xf32>
    %cst_45 = arith.constant dense<0.000000e+00> : vector<64x32xf32>
    %66 = tpu.matmul %56, %65, %cst_45 {dimension_numbers = #tpu.dot_dimension_numbers<[1], [0], [0], [1], [0, 0, 1, 1], [], []>} : vector<64x64xf32>, vector<64x32xf32>, vector<64x32xf32> -> vector<64x32xf32>
    %c1_46 = arith.constant 1 : index
    %c0_47 = arith.constant 0 : index
    %67 = vector.load %arg12[%c1_46, %c0_47] : memref<66x64xf32, #tpu.memory_space<vmem>>, vector<64x64xf32>
    %c1_48 = arith.constant 1 : index
    %c0_49 = arith.constant 0 : index
    %c0_50 = arith.constant 0 : index
    %68 = vector.load %arg4[%c1_48, %c0_49, %c0_50] : memref<3x64x32xf32, #tpu.memory_space<vmem>>, vector<1x64x32xf32>
    %69 = vector.shape_cast %68 : vector<1x64x32xf32> to vector<64x32xf32>
    %cst_51 = arith.constant dense<0.000000e+00> : vector<64x32xf32>
    %70 = tpu.matmul %67, %69, %cst_51 {dimension_numbers = #tpu.dot_dimension_numbers<[1], [0], [0], [1], [0, 0, 1, 1], [], []>} : vector<64x64xf32>, vector<64x32xf32>, vector<64x32xf32> -> vector<64x32xf32>
    %71 = arith.addf %66, %70 : vector<64x32xf32>
    %c2_52 = arith.constant 2 : index
    %c0_53 = arith.constant 0 : index
    %c0_54 = arith.constant 0 : index
    %72 = vector.load %arg4[%c2_52, %c0_53, %c0_54] : memref<3x64x32xf32, #tpu.memory_space<vmem>>, vector<1x64x32xf32>
    %73 = vector.shape_cast %72 : vector<1x64x32xf32> to vector<64x32xf32>
    %cst_55 = arith.constant dense<0.000000e+00> : vector<64x32xf32>
    %74 = tpu.matmul %63, %73, %cst_55 {dimension_numbers = #tpu.dot_dimension_numbers<[1], [0], [0], [1], [0, 0, 1, 1], [], []>} : vector<64x64xf32>, vector<64x32xf32>, vector<64x32xf32> -> vector<64x32xf32>
    %75 = arith.addf %71, %74 : vector<64x32xf32>
    %c0_56 = arith.constant 0 : index
    %c0_57 = arith.constant 0 : index
    %76 = vector.load %arg5[%c0_56, %c0_57] : memref<1x32xf32, #tpu.memory_space<vmem>>, vector<1x32xf32>
    %77 = vector.broadcast %76 : vector<1x32xf32> to vector<64x32xf32>
    %78 = arith.addf %75, %77 : vector<64x32xf32>
    %cst_58 = arith.constant 0.000000e+00 : f32
    %79 = vector.broadcast %cst_58 : f32 to vector<64x32xf32>
    %80 = arith.maximumf %78, %79 : vector<64x32xf32>
    %c0_59 = arith.constant 0 : index
    %c0_60 = arith.constant 0 : index
    %81 = vector.load %arg13[%c0_59, %c0_60] : memref<64x32xf32, #tpu.memory_space<vmem>>, vector<64x32xf32>
    tpu.vector_store %arg13[%c0_59, %c0_60], %80 {strides = array<i32>} : memref<64x32xf32, #tpu.memory_space<vmem>>, vector<64x32xf32>,
    %c0_61 = arith.constant 0 : index
    %c0_62 = arith.constant 0 : index
    %82 = tpu.strided_load %arg13[%c0_61, %c0_62] {strides = array<i32: 2, 1>} : memref<64x32xf32, #tpu.memory_space<vmem>>, vector<32x32xf32>
    %c1_63 = arith.constant 1 : index
    %c0_64 = arith.constant 0 : index
    %83 = tpu.strided_load %arg13[%c1_63, %c0_64] {strides = array<i32: 2, 1>} : memref<64x32xf32, #tpu.memory_space<vmem>>, vector<32x32xf32>
    %84 = arith.maximumf %82, %83 : vector<32x32xf32>
    %85 = vector.extract_strided_slice %84 {offsets = [0, 0], sizes = [32, 16], strides = [1, 1]} : vector<32x32xf32> to vector<32x16xf32>
    %86 = vector.extract_strided_slice %84 {offsets = [0, 16], sizes = [32, 16], strides = [1, 1]} : vector<32x32xf32> to vector<32x16xf32>
    %87 = arith.maximumf %85, %86 : vector<32x16xf32>
    %c0_65 = arith.constant 0 : index
    %c0_66 = arith.constant 0 : index
    %88 = vector.load %arg14[%c0_65, %c0_66] : memref<32x16xf32, #tpu.memory_space<vmem>>, vector<32x16xf32>
    tpu.vector_store %arg14[%c0_65, %c0_66], %87 {strides = array<i32>} : memref<32x16xf32, #tpu.memory_space<vmem>>, vector<32x16xf32>,
    %cst_67 = arith.constant 0.000000e+00 : f32
    %89 = vector.broadcast %cst_67 : f32 to vector<8x32xf32>
    %c0_68 = arith.constant 0 : index
    %c0_69 = arith.constant 0 : index
    %90 = tpu.strided_load %arg14[%c0_68, %c0_69] {strides = array<i32: 4, 1>} : memref<32x16xf32, #tpu.memory_space<vmem>>, vector<8x16xf32>
    %c0_70 = arith.constant 0 : index
    %c0_71 = arith.constant 0 : index
    %c0_72 = arith.constant 0 : index
    %91 = vector.load %arg6[%c0_70, %c0_71, %c0_72] : memref<4x16x32xf32, #tpu.memory_space<vmem>>, vector<1x16x32xf32>
    %92 = vector.shape_cast %91 : vector<1x16x32xf32> to vector<16x32xf32>
    %cst_73 = arith.constant dense<0.000000e+00> : vector<8x32xf32>
    %93 = tpu.matmul %90, %92, %cst_73 {dimension_numbers = #tpu.dot_dimension_numbers<[1], [0], [0], [1], [0, 0, 1, 1], [], []>} : vector<8x16xf32>, vector<16x32xf32>, vector<8x32xf32> -> vector<8x32xf32>
    %94 = arith.addf %89, %93 : vector<8x32xf32>
    %c1_74 = arith.constant 1 : index
    %c0_75 = arith.constant 0 : index
    %95 = tpu.strided_load %arg14[%c1_74, %c0_75] {strides = array<i32: 4, 1>} : memref<32x16xf32, #tpu.memory_space<vmem>>, vector<8x16xf32>
    %c1_76 = arith.constant 1 : index
    %c0_77 = arith.constant 0 : index
    %c0_78 = arith.constant 0 : index
    %96 = vector.load %arg6[%c1_76, %c0_77, %c0_78] : memref<4x16x32xf32, #tpu.memory_space<vmem>>, vector<1x16x32xf32>
    %97 = vector.shape_cast %96 : vector<1x16x32xf32> to vector<16x32xf32>
    %cst_79 = arith.constant dense<0.000000e+00> : vector<8x32xf32>
    %98 = tpu.matmul %95, %97, %cst_79 {dimension_numbers = #tpu.dot_dimension_numbers<[1], [0], [0], [1], [0, 0, 1, 1], [], []>} : vector<8x16xf32>, vector<16x32xf32>, vector<8x32xf32> -> vector<8x32xf32>
    %99 = arith.addf %94, %98 : vector<8x32xf32>
    %c2_80 = arith.constant 2 : index
    %c0_81 = arith.constant 0 : index
    %100 = tpu.strided_load %arg14[%c2_80, %c0_81] {strides = array<i32: 4, 1>} : memref<32x16xf32, #tpu.memory_space<vmem>>, vector<8x16xf32>
    %c2_82 = arith.constant 2 : index
    %c0_83 = arith.constant 0 : index
    %c0_84 = arith.constant 0 : index
    %101 = vector.load %arg6[%c2_82, %c0_83, %c0_84] : memref<4x16x32xf32, #tpu.memory_space<vmem>>, vector<1x16x32xf32>
    %102 = vector.shape_cast %101 : vector<1x16x32xf32> to vector<16x32xf32>
    %cst_85 = arith.constant dense<0.000000e+00> : vector<8x32xf32>
    %103 = tpu.matmul %100, %102, %cst_85 {dimension_numbers = #tpu.dot_dimension_numbers<[1], [0], [0], [1], [0, 0, 1, 1], [], []>} : vector<8x16xf32>, vector<16x32xf32>, vector<8x32xf32> -> vector<8x32xf32>
    %104 = arith.addf %99, %103 : vector<8x32xf32>
    %c3 = arith.constant 3 : index
    %c0_86 = arith.constant 0 : index
    %105 = tpu.strided_load %arg14[%c3, %c0_86] {strides = array<i32: 4, 1>} : memref<32x16xf32, #tpu.memory_space<vmem>>, vector<8x16xf32>
    %c3_87 = arith.constant 3 : index
    %c0_88 = arith.constant 0 : index
    %c0_89 = arith.constant 0 : index
    %106 = vector.load %arg6[%c3_87, %c0_88, %c0_89] : memref<4x16x32xf32, #tpu.memory_space<vmem>>, vector<1x16x32xf32>
    %107 = vector.shape_cast %106 : vector<1x16x32xf32> to vector<16x32xf32>
    %cst_90 = arith.constant dense<0.000000e+00> : vector<8x32xf32>
    %108 = tpu.matmul %105, %107, %cst_90 {dimension_numbers = #tpu.dot_dimension_numbers<[1], [0], [0], [1], [0, 0, 1, 1], [], []>} : vector<8x16xf32>, vector<16x32xf32>, vector<8x32xf32> -> vector<8x32xf32>
    %109 = arith.addf %104, %108 : vector<8x32xf32>
    %c0_91 = arith.constant 0 : index
    %c0_92 = arith.constant 0 : index
    %110 = vector.load %arg7[%c0_91, %c0_92] : memref<1x32xf32, #tpu.memory_space<vmem>>, vector<1x32xf32>
    %111 = vector.broadcast %110 : vector<1x32xf32> to vector<8x32xf32>
    %112 = arith.addf %109, %111 : vector<8x32xf32>
    %cst_93 = arith.constant 0.000000e+00 : f32
    %113 = vector.broadcast %cst_93 : f32 to vector<8x32xf32>
    %114 = arith.maximumf %112, %113 : vector<8x32xf32>
    %c0_94 = arith.constant 0 : index
    %c0_95 = arith.constant 0 : index
    %115 = vector.load %arg8[%c0_94, %c0_95] : memref<32x10xf32, #tpu.memory_space<vmem>>, vector<32x10xf32>
    %cst_96 = arith.constant dense<0.000000e+00> : vector<8x10xf32>
    %116 = tpu.matmul %114, %115, %cst_96 {dimension_numbers = #tpu.dot_dimension_numbers<[1], [0], [0], [1], [0, 0, 1, 1], [], []>} : vector<8x32xf32>, vector<32x10xf32>, vector<8x10xf32> -> vector<8x10xf32>
    %c0_97 = arith.constant 0 : index
    %c0_98 = arith.constant 0 : index
    %117 = vector.load %arg9[%c0_97, %c0_98] : memref<1x10xf32, #tpu.memory_space<vmem>>, vector<1x10xf32>
    %118 = vector.broadcast %117 : vector<1x10xf32> to vector<8x10xf32>
    %119 = arith.addf %116, %118 : vector<8x10xf32>
    %c0_99 = arith.constant 0 : index
    %c0_100 = arith.constant 0 : index
    %120 = vector.load %arg10[%c0_99, %c0_100] : memref<8x10xf32, #tpu.memory_space<vmem>>, vector<8x10xf32>
    tpu.vector_store %arg10[%c0_99, %c0_100], %119 {strides = array<i32>} : memref<8x10xf32, #tpu.memory_space<vmem>>, vector<8x10xf32>,
    return
  }
  func.func @transform_0(%arg0: i32) -> (i32, i32, i32) {
    %c0_i32 = arith.constant 0 : i32
    %c0_i32_0 = arith.constant 0 : i32
    %c0_i32_1 = arith.constant 0 : i32
    return %arg0, %c0_i32, %c0_i32_0 : i32, i32, i32
  }
  func.func @transform_1(%arg0: i32) -> (i32, i32, i32) {
    %c0_i32 = arith.constant 0 : i32
    %c0_i32_0 = arith.constant 0 : i32
    %c0_i32_1 = arith.constant 0 : i32
    %c0_i32_2 = arith.constant 0 : i32
    return %c0_i32, %c0_i32_0, %c0_i32_1 : i32, i32, i32
  }
  func.func @transform_2(%arg0: i32) -> (i32, i32) {
    %c0_i32 = arith.constant 0 : i32
    %c0_i32_0 = arith.constant 0 : i32
    %c0_i32_1 = arith.constant 0 : i32
    return %c0_i32, %c0_i32_0 : i32, i32
  }
  func.func @transform_3(%arg0: i32) -> (i32, i32, i32) {
    %c0_i32 = arith.constant 0 : i32
    %c0_i32_0 = arith.constant 0 : i32
    %c0_i32_1 = arith.constant 0 : i32
    %c0_i32_2 = arith.constant 0 : i32
    return %c0_i32, %c0_i32_0, %c0_i32_1 : i32, i32, i32
  }
  func.func @transform_4(%arg0: i32) -> (i32, i32) {
    %c0_i32 = arith.constant 0 : i32
    %c0_i32_0 = arith.constant 0 : i32
    %c0_i32_1 = arith.constant 0 : i32
    return %c0_i32, %c0_i32_0 : i32, i32
  }
  func.func @transform_5(%arg0: i32) -> (i32, i32, i32) {
    %c0_i32 = arith.constant 0 : i32
    %c0_i32_0 = arith.constant 0 : i32
    %c0_i32_1 = arith.constant 0 : i32
    %c0_i32_2 = arith.constant 0 : i32
    return %c0_i32, %c0_i32_0, %c0_i32_1 : i32, i32, i32
  }
  func.func @transform_6(%arg0: i32) -> (i32, i32) {
    %c0_i32 = arith.constant 0 : i32
    %c0_i32_0 = arith.constant 0 : i32
    %c0_i32_1 = arith.constant 0 : i32
    return %c0_i32, %c0_i32_0 : i32, i32
  }
  func.func @transform_7(%arg0: i32) -> (i32, i32) {
    %c0_i32 = arith.constant 0 : i32
    %c0_i32_0 = arith.constant 0 : i32
    %c0_i32_1 = arith.constant 0 : i32
    return %c0_i32, %c0_i32_0 : i32, i32
  }
  func.func @transform_8(%arg0: i32) -> (i32, i32) {
    %c0_i32 = arith.constant 0 : i32
    %c0_i32_0 = arith.constant 0 : i32
    %c0_i32_1 = arith.constant 0 : i32
    return %c0_i32, %c0_i32_0 : i32, i32
  }
  func.func @transform_9(%arg0: i32) -> (i32, i32) {
    %c0_i32 = arith.constant 0 : i32
    %c0_i32_0 = arith.constant 0 : i32
    return %arg0, %c0_i32 : i32, i32
  }
}

</mosaic_0001>

<bundles_post_ra>
// kernel: letter_rec_forward.1
= control target key start
LH: loop header
LB: loop body
LE: loop exit
PB: predicated region body
PF: predicated region fallthrough
CT: control target
= control target key end

     0   :  { %v32_v3 = vlaneseq  ;;  %vm260_vm1 = vcmask 588800   ;;  %s1472_s10 = smov 112   ;;  %s2114_s1 = inlined_call_operand.vmem [shape: f32[3,72,128], index: 1, kind: input, shape index: {}]   ;;  %s2115_s0 = inlined_call_operand.vmem [shape: f32[1,130,72], index: 0, kind: input, shape index: {}]   ;;  %s2116_s2 = inlined_call_operand.vmem [shape: f32[1,128], index: 2, kind: input, shape index: {}]   ;;  %s2117_s3 = inlined_call_operand.vmem [shape: f32[3,64,32], index: 3, kind: input, shape index: {}]   ;;  %s2118_s4 = inlined_call_operand.vmem [shape: f32[1,32], index: 4, kind: input, shape index: {}]   ;;  %s2119_s5 = inlined_call_operand.vmem [shape: f32[4,16,32], index: 5, kind: input, shape index: {}]   ;;  %s2120_s6 = inlined_call_operand.vmem [shape: f32[1,32], index: 6, kind: input, shape index: {}]   ;;  %s2121_s8 = inlined_call_operand.vmem [shape: f32[1,10], index: 8, kind: input, shape index: {}]   ;;  %s2122_s7 = inlined_call_operand.vmem [shape: f32[32,10], index: 7, kind: input, shape index: {}]   ;;  %s2123_s9 = inlined_call_operand.vmem [shape: f32[8,10], index: 9, kind: output, shape index: {}]  }
   0x1   :  { %v1337_v0 = vld [vmem:[%s2114_s1 + $0x88] sm:$0xff]  ;;  %v233_v1 = vld [vmem:[%s2114_s1 + $0x40] sm:$0xff]  ;;  %v232_v4 = vld [vmem:[%s2114_s1 + $0x38] sm:$0xff] }
   0x2   :  { %v1336_v2 = vld [vmem:[%s2114_s1 + $0x80] sm:$0xff]  ;;  %316 = vmatpush.msra.mxu0 %v1337_v0  ;;  %429 = vmatpush.msra.mxu1 %v233_v1  ;;  %v1335_v5 = vld [vmem:[%s2114_s1 + $0x78] sm:$0xff]  ;;  %v231_v6 = vld [vmem:[%s2114_s1 + $0x30] sm:$0xff]  ;;  %v1553_v11 = vshrl.u32 %v32_v3, 7 }
   0x3   :  { %v1378_v7 = vld [vmem:[%s2114_s1 + $0xd0] sm:$0xff]  ;;  %v1377_v8 = vld [vmem:[%s2114_s1 + $0xc8] sm:$0xff]  ;;  %v1376_v12 = vld [vmem:[%s2114_s1 + $0xc0] sm:$0xff] }
   0x4   :  { %317 = vmatpush.msra.mxu0 %v1336_v2  ;;  %430 = vmatpush.msra.mxu1 %v232_v4  ;;  %v1334_v9 = vld [vmem:[%s2114_s1 + $0x70] sm:$0xff]  ;;  %v230_v10 = vld [vmem:[%s2114_s1 + $0x28] sm:$0xff]  ;;  %v229_v14 = vld [vmem:[%s2114_s1 + $0x20] sm:$0xff]  ;;  %v49_v18 = vand.u32 15, %v1553_v11  ;;  %v1575_v19 = vadd.s32 8, %v1553_v11  ;;  %v1629_v38 = vadd.s32 16, %v1553_v11 }
   0x5   :  { %1446 = vmatpush.msra.mxu2 %v1378_v7  ;;  %v1333_v13 = vld [vmem:[%s2114_s1 + $0x68] sm:$0xff]  ;;  %v1375_v15 = vld [vmem:[%s2114_s1 + $0xb8] sm:$0xff]  ;;  %v1332_v16 = vld [vmem:[%s2114_s1 + $0x60] sm:$0xff]  ;;  %v1640_v42 = vadd.s32 24, %v1553_v11  ;;  %v1661_v50 = vadd.s32 32, %v1553_v11  ;;  %v1672_v54 = vadd.s32 40, %v1553_v11 }
   0x6   :  { %318 = vmatpush.msra.mxu0 %v1335_v5  ;;  %431 = vmatpush.msra.mxu1 %v231_v6  ;;  %v228_v17 = vld [vmem:[%s2114_s1 + $0x18] sm:$0xff]  ;;  %v1374_v20 = vld [vmem:[%s2114_s1 + $0xb0] sm:$0xff]  ;;  %v1373_v23 = vld [vmem:[%s2114_s1 + $0xa8] sm:$0xff]  ;;  %vm1595_vm0 = vcmp.ne.s32.totalorder %v49_v18, 0  ;;  %v50_v28 = vand.u32 15, %v1575_v19  ;;  %v51_v41 = vand.u32 15, %v1629_v38 }
   0x7   :  { %1447 = vmatpush.msra.mxu2 %v1377_v8  ;;  %v1331_v21 = vld [vmem:[%s2114_s1 + $0x58] sm:$0xff]  ;;  %v227_v22 = vld [vmem:[%s2114_s1 + $0x10] sm:$0xff]  ;;  %v226_v25 = vld [vmem:[%s2114_s1 + $0x8] sm:$0xff]  ;;  %v52_v45 = vand.u32 15, %v1640_v42  ;;  %v53_v53 = vand.u32 15, %v1661_v50  ;;  %v54_v57 = vand.u32 15, %v1672_v54 }
   0x8   :  { %319 = vmatpush.msra.mxu0 %v1334_v9  ;;  %432 = vmatpush.msra.mxu1 %v230_v10  ;;  %v1330_v24 = vld [vmem:[%s2114_s1 + $0x50] sm:$0xff]  ;;  %v81_v27 = vld [vmem:[%s2115_s0] sm:$0xff]  ;;  %v1329_v30 = vld [vmem:[%s2114_s1 + $0x48] sm:$0xff]  ;;  %vm146_vm2 = vcmp.ne.s32.totalorder %v50_v28, 15  ;;  %vm67_vm3 = vcmp.ne.s32.totalorder %v51_v41, 0  ;;  %v1693_v62 = vadd.s32 48, %v1553_v11 }
   0x9   :  { %1448 = vmatpush.msra.mxu2 %v1376_v12  ;;  %v1372_v29 = vld [vmem:[%s2114_s1 + $0xa0] sm:$0xff]  ;;  %v129_v33 = vsel %vm1595_vm0, %v81_v27, 0.0  ;;  %v1371_v34 = vld [vmem:[%s2114_s1 + $0x98] sm:$0xff]  ;;  %v162_v35 = vld [vmem:[%s2115_s0 + $0xa] sm:$0xff]  ;;  %vm148_vm4 = vcmp.ne.s32.totalorder %v52_v45, 15  ;;  %vm69_vm5 = vcmp.ne.s32.totalorder %v53_v53, 0 }
   0xa   :  { %320 = vmatpush.msra.mxu0 %v1333_v13  ;;  %433 = vmatpush.msra.mxu1 %v229_v14  ;;  %v225_v31 = vld [vmem:[%s2114_s1] sm:$0xff]  ;;  %v1370_v36 = vld [vmem:[%s2114_s1 + $0x90] sm:$0xff]  ;;  %v210_v37 = vsel %vm146_vm2, %v162_v35, 0.0  ;;  %v82_v40 = vld [vmem:[%s2115_s0 + $0x8] sm:$0xff]  ;;  %vm150_vm6 = vcmp.ne.s32.totalorder %v54_v57, 15  ;;  %v55_v1 = vand.u32 15, %v1693_v62 }
   0xb   :  { %1449 = vmatpush.msra.mxu2 %v1375_v15  ;;  %v234_v32 = vld [vmem:[%s2115_s0 + $0x1] sm:$0xff]  ;;  %v235_v39 = vld [vmem:[%s2115_s0 + $0x9] sm:$0xff]  ;;  %v163_v43 = vld [vmem:[%s2115_s0 + $0x12] sm:$0xff]  ;;  %v1704_v2 = vadd.s32 56, %v1553_v11  ;;  %v41_v10 = vadd.s32 64, %v1553_v11  ;;  %v44_v28 = vadd.s32 88, %v1553_v11 }
   0xc   :  { %321 = vmatpush.msra.mxu0 %v1332_v16  ;;  %434 = vmatpush.msra.mxu1 %v228_v17  ;;  %v83_v44 = vld [vmem:[%s2115_s0 + $0x10] sm:$0xff]  ;;  %v164_v48 = vld [vmem:[%s2115_s0 + $0x1a] sm:$0xff]  ;;  %v165_v55 = vld [vmem:[%s2115_s0 + $0x22] sm:$0xff]  ;;  %vm71_vm7 = vcmp.ne.s32.totalorder %v55_v1, 0  ;;  %v46_v41 = vadd.s32 104, %v1553_v11  ;;  %vm766_vm2 = vcmask 517120  }
   0xd   :  { %1450 = vmatpush.msra.mxu2 %v1374_v20  ;;  %v236_v46 = vld [vmem:[%s2115_s0 + $0x11] sm:$0xff]  ;;  %v131_v47 = vsel %vm67_vm3, %v83_v44, 0.0  ;;  %v212_v49 = vsel %vm148_vm4, %v164_v48, 0.0  ;;  %v237_v51 = vld [vmem:[%s2115_s0 + $0x19] sm:$0xff]  ;;  %v238_v58 = vld [vmem:[%s2115_s0 + $0x21] sm:$0xff]  ;;  %v56_v5 = vand.u32 15, %v1704_v2 }
   0xe   :  { %322 = vmatpush.msra.mxu0 %v1331_v21  ;;  %435 = vmatpush.msra.mxu1 %v227_v22  ;;  %v84_v52 = vld [vmem:[%s2115_s0 + $0x18] sm:$0xff]  ;;  %v85_v56 = vld [vmem:[%s2115_s0 + $0x20] sm:$0xff]  ;;  %v166_v60 = vld [vmem:[%s2115_s0 + $0x2a] sm:$0xff]  ;;  %v57_v14 = vand.u32 15, %v41_v10  ;;  %v62_v45 = vand.u32 15, %v46_v41 }
   0xf   :  { %1451 = vmatpush.msra.mxu2 %v1373_v23  ;;  %v133_v59 = vsel %vm69_vm5, %v85_v56, 0.0  ;;  %v214_v61 = vsel %vm150_vm6, %v166_v60, 0.0  ;;  %v239_v63 = vld [vmem:[%s2115_s0 + $0x29] sm:$0xff]  ;;  %v167_v3 = vld [vmem:[%s2115_s0 + $0x32] sm:$0xff]  ;;  %vm152_vm8 = vcmp.ne.s32.totalorder %v56_v5, 15  ;;  %v89_v17 = vld [vmem:[%s2115_s0 + $0x40] sm:$0xff] }
  0x10   :  { %323 = vmatpush.msra.mxu0 %v1330_v24  ;;  %436 = vmatpush.msra.mxu1 %v226_v25  ;;  %v86_v0 = vld [vmem:[%s2115_s0 + $0x28] sm:$0xff]  ;;  %v87_v4 = vld [vmem:[%s2115_s0 + $0x30] sm:$0xff]  ;;  %v88_v13 = vld [vmem:[%s2115_s0 + $0x38] sm:$0xff]  ;;  %vm73_vm9 = vcmp.ne.s32.totalorder %v57_v14, 0  ;;  %v43_v24 = vadd.s32 80, %v1553_v11  ;;  %vm158_vm14 = vcmp.ne.s32.totalorder %v62_v45, 15 }
  0x11   :  { %1452 = vmatpush.msra.mxu2 %v1372_v29  ;;  %v240_v6 = vld [vmem:[%s2115_s0 + $0x31] sm:$0xff]  ;;  %v169_v16 = vld [vmem:[%s2115_s0 + $0x42] sm:$0xff]  ;;  %v137_v21 = vsel %vm73_vm9, %v89_v17, 0.0  ;;  %v48_v56 = vadd.s32 120, %v1553_v11  ;;  %v249_v1 = vld [vmem:[%s2115_s0 + $0x79] sm:$0xff] }
  0x12   :  { %324 = vmatpush.msra.mxu0 %v1329_v30  ;;  %437 = vmatpush.msra.mxu1 %v225_v31  ;;  %v170_v22 = vld [vmem:[%s2115_s0 + $0x4a] sm:$0xff]  ;;  %v59_v27 = vand.u32 15, %v43_v24  ;;  %v60_v31 = vand.u32 15, %v44_v28  ;;  %v93_v44 = vld [vmem:[%s2115_s0 + $0x60] sm:$0xff]  ;;  %v175_v57 = vld [vmem:[%s2115_s0 + $0x72] sm:$0xff] }
  0x13   :  { %1338 = vmatmul.msk.f32.vlgmr.msra.gmra.mxu0 %vm260_vm1, %v234_v32  ;;  %1354 = vmatmul.msk.f32.vlgmr.msra.gmra.mxu1 %vm260_vm1, %v129_v33  ;;  %v243_v25 = vld [vmem:[%s2115_s0 + $0x49] sm:$0xff]  ;;  %v244_v32 = vld [vmem:[%s2115_s0 + $0x51] sm:$0xff] }
  0x14   :  { %1453 = vmatpush.msra.mxu2 %v1371_v34  ;;  %552 = vmatpush.msrb.mxu0 %v1378_v7  ;;  %v135_v7 = vsel %vm71_vm7, %v87_v4, 0.0  ;;  %v90_v26 = vld [vmem:[%s2115_s0 + $0x48] sm:$0xff]  ;;  %vm75_vm11 = vcmp.ne.s32.totalorder %v59_v27, 0  ;;  %v91_v30 = vld [vmem:[%s2115_s0 + $0x50] sm:$0xff]  ;;  %vm156_vm12 = vcmp.ne.s32.totalorder %v60_v31, 15 }
  0x15   :  { %v139_v33 = vsel %vm75_vm11, %v91_v30, 0.0  ;;  %v174_v48 = vld [vmem:[%s2115_s0 + $0x6a] sm:$0xff] }
  0x16   :  { %1454 = vmatpush.msra.mxu2 %v1370_v36  ;;  %553 = vmatpush.msrb.mxu0 %v1377_v8  ;;  %v168_v8 = vld [vmem:[%s2115_s0 + $0x3a] sm:$0xff]  ;;  %v94_v53 = vld [vmem:[%s2115_s0 + $0x68] sm:$0xff]  ;;  %v248_v60 = vld [vmem:[%s2115_s0 + $0x71] sm:$0xff] }
  0x17   :  { %1380 = vmatmul.msk.f32.vlgmr.msra.gmra.mxu2 %vm260_vm1, %v210_v37  ;;  %v216_v9 = vsel %vm152_vm8, %v168_v8, 0.0  ;;  %v245_v37 = vld [vmem:[%s2115_s0 + $0x59] sm:$0xff] }
  0x18   :  { %554 = vmatpush.msrb.mxu0 %v1376_v12  ;;  %v241_v12 = vld [vmem:[%s2115_s0 + $0x39] sm:$0xff] }
  0x1a   :  { %555 = vmatpush.msrb.mxu0 %v1375_v15  ;;  %v42_v15 = vadd.s32 72, %v1553_v11 }
  0x1b   :  { %1339 = vmatmul.msk.f32.gmra.mxu0 %vm260_vm1, %v235_v39  ;;  %1355 = vmatmul.msk.f32.gmra.mxu1 %vm260_vm1, %v82_v40  ;;  %v92_v39 = vld [vmem:[%s2115_s0 + $0x58] sm:$0xff] }
  0x1c   :  { %556 = vmatpush.msrb.mxu0 %v1374_v20  ;;  %v58_v18 = vand.u32 15, %v42_v15  ;;  %v242_v20 = vld [vmem:[%s2115_s0 + $0x41] sm:$0xff] }
  0x1e   :  { %557 = vmatpush.msrb.mxu0 %v1373_v23  ;;  %vm154_vm10 = vcmp.ne.s32.totalorder %v58_v18, 15 }
  0x1f   :  { %1381 = vmatmul.msk.f32.gmra.mxu2 %vm260_vm1, %v163_v43  ;;  %v218_v23 = vsel %vm154_vm10, %v170_v22, 0.0  ;;  %v173_v43 = vld [vmem:[%s2115_s0 + $0x62] sm:$0xff] }
  0x20   :  { %558 = vmatpush.msrb.mxu0 %v1372_v29  ;;  %v171_v29 = vld [vmem:[%s2115_s0 + $0x52] sm:$0xff] }
  0x22   :  { %559 = vmatpush.msrb.mxu0 %v1371_v34  ;;  %v172_v34 = vld [vmem:[%s2115_s0 + $0x5a] sm:$0xff] }
  0x23   :  { %1340 = vmatmul.msk.f32.gmra.mxu0 %vm260_vm1, %v236_v46  ;;  %1356 = vmatmul.msk.f32.gmra.mxu1 %vm260_vm1, %v131_v47  ;;  %v220_v35 = vsel %vm156_vm12, %v172_v34, 0.0  ;;  %v246_v46 = vld [vmem:[%s2115_s0 + $0x61] sm:$0xff] }
  0x24   :  { %560 = vmatpush.msrb.mxu0 %v1370_v36  ;;  %v45_v36 = vadd.s32 96, %v1553_v11 }
  0x26   :  { %v61_v40 = vand.u32 15, %v45_v36 }
  0x27   :  { %1382 = vmatmul.msk.f32.gmra.mxu2 %vm260_vm1, %v212_v49  ;;  %v222_v49 = vsel %vm158_vm14, %v174_v48, 0.0 }
  0x28   :  { %vm77_vm13 = vcmp.ne.s32.totalorder %v61_v40, 0 }
  0x29   :  { %v141_v47 = vsel %vm77_vm13, %v93_v44, 0.0 }
  0x2b   :  { %1341 = vmatmul.msk.f32.gmra.mxu0 %vm260_vm1, %v237_v51  ;;  %1357 = vmatmul.msk.f32.gmra.mxu1 %vm260_vm1, %v84_v52  ;;  %v47_v51 = vadd.s32 112, %v1553_v11  ;;  %v247_v52 = vld [vmem:[%s2115_s0 + $0x69] sm:$0xff] }
  0x2f   :  { %1383 = vmatmul.msk.f32.gmra.mxu2 %vm260_vm1, %v165_v55  ;;  %v63_v55 = vand.u32 15, %v47_v51 }
  0x31   :  { %vm79_vm15 = vcmp.ne.s32.totalorder %v63_v55, 0 }
  0x33   :  { %1342 = vmatmul.msk.f32.gmra.mxu0 %vm260_vm1, %v238_v58  ;;  %1358 = vmatmul.msk.f32.gmra.mxu1 %vm260_vm1, %v133_v59  ;;  %v95_v58 = vld [vmem:[%s2115_s0 + $0x70] sm:$0xff]  ;;  %v64_v59 = vand.u32 15, %v48_v56 }
  0x35   :  { %vm160_vm0 = vcmp.ne.s32.totalorder %v64_v59, 15 }
  0x37   :  { %1384 = vmatmul.msk.f32.gmra.mxu2 %vm260_vm1, %v214_v61  ;;  %v143_v61 = vsel %vm79_vm15, %v95_v58, 0.0 }
  0x3b   :  { %1343 = vmatmul.msk.f32.gmra.mxu0 %vm260_vm1, %v239_v63  ;;  %1359 = vmatmul.msk.f32.gmra.mxu1 %vm260_vm1, %v86_v0  ;;  %v176_v63 = vld [vmem:[%s2115_s0 + $0x7a] sm:$0xff] }
  0x3c   :  { %v224_v0 = vsel %vm160_vm0, %v176_v63, 0.0 }
  0x3f   :  { %1385 = vmatmul.msk.f32.gmra.mxu2 %vm260_vm1, %v167_v3  ;;  %v96_v3 = vld [vmem:[%s2115_s0 + $0x78] sm:$0xff] }
  0x43   :  { %1344 = vmatmul.msk.f32.gmra.mxu0 %vm260_vm1, %v240_v6  ;;  %1360 = vmatmul.msk.f32.gmra.mxu1 %vm260_vm1, %v135_v7  ;;  %v161_v6 = vld [vmem:[%s2115_s0 + $0x2] sm:$0xff]  ;;  %s1470_s0 = smov 64  }
  0x47   :  { %1386 = vmatmul.msk.f32.gmra.mxu2 %vm260_vm1, %v216_v9 }
  0x4b   :  { %1345 = vmatmul.msk.f32.gmra.mxu0 %vm260_vm1, %v241_v12  ;;  %1361 = vmatmul.msk.f32.gmra.mxu1 %vm260_vm1, %v88_v13  ;;  %v1846_v12 = vld [vmem:[%s2116_s2] ss:$0 sm:$0xff] }
  0x4f   :  { %1387 = vmatmul.msk.f32.gmra.mxu2 %vm260_vm1, %v169_v16 }
  0x53   :  { %1346 = vmatmul.msk.f32.gmra.mxu0 %vm260_vm1, %v242_v20  ;;  %1362 = vmatmul.msk.f32.gmra.mxu1 %vm260_vm1, %v137_v21 }
  0x57   :  { %1388 = vmatmul.msk.f32.gmra.mxu2 %vm260_vm1, %v218_v23 }
  0x5b   :  { %1347 = vmatmul.msk.f32.gmra.mxu0 %vm260_vm1, %v243_v25  ;;  %1363 = vmatmul.msk.f32.gmra.mxu1 %vm260_vm1, %v90_v26 }
  0x5f   :  { %1389 = vmatmul.msk.f32.gmra.mxu2 %vm260_vm1, %v171_v29 }
  0x63   :  { %1348 = vmatmul.msk.f32.gmra.mxu0 %vm260_vm1, %v244_v32  ;;  %1364 = vmatmul.msk.f32.gmra.mxu1 %vm260_vm1, %v139_v33 }
  0x67   :  { %1390 = vmatmul.msk.f32.gmra.mxu2 %vm260_vm1, %v220_v35 }
  0x6b   :  { %1349 = vmatmul.msk.f32.gmra.mxu0 %vm260_vm1, %v245_v37  ;;  %1365 = vmatmul.msk.f32.gmra.mxu1 %vm260_vm1, %v92_v39 }
  0x6f   :  { %1391 = vmatmul.msk.f32.gmra.mxu2 %vm260_vm1, %v173_v43 }
  0x73   :  { %1350 = vmatmul.msk.f32.gmra.mxu0 %vm260_vm1, %v246_v46  ;;  %1366 = vmatmul.msk.f32.gmra.mxu1 %vm260_vm1, %v141_v47 }
  0x77   :  { %1392 = vmatmul.msk.f32.gmra.mxu2 %vm260_vm1, %v222_v49 }
  0x7b   :  { %1351 = vmatmul.msk.f32.gmra.mxu0 %vm260_vm1, %v247_v52  ;;  %1367 = vmatmul.msk.f32.gmra.mxu1 %vm260_vm1, %v94_v53 }
  0x7f   :  { %1393 = vmatmul.msk.f32.gmra.mxu2 %vm260_vm1, %v175_v57 }
  0x83   :  { %1352 = vmatmul.msk.f32.gmra.mxu0 %vm260_vm1, %v248_v60  ;;  %1368 = vmatmul.msk.f32.gmra.mxu1 %vm260_vm1, %v143_v61 }
  0x87   :  { %1394 = vmatmul.msk.f32.gmra.mxu2 %vm260_vm1, %v224_v0 }
  0x8b   :  { %1353 = vmatmul.msk.f32.gmra.mxu0 %vm260_vm1, %v249_v1  ;;  %1369 = vmatmul.msk.f32.gmra.mxu1 %vm260_vm1, %v96_v3 }
  0x90   :  { %v326_v4 = vpop.f32.mrf.mxu0  ;;  %v439_v5 = vpop.f32.mrf.mxu1 }
  0x91   :  { %v1840_v7 = vadd.f32 %v439_v5, %v326_v4 }
  0x93   :  { %1379 = vmatmul.msk.f32.vlgmr.msrb.gmra.mxu0 %vm260_vm1, %v161_v6  ;;  %vm757_vm1 = vcmask 523264  }
  0x98   :  { %v329_v8 = vpop.f32.mrf.mxu0  ;;  %v442_v9 = vpop.f32.mrf.mxu1 }
  0x99   :  { %v443_v10 = vadd.f32 %v442_v9, %v329_v8 }
  0x9a   :  { %v565_v13 = vpop.f32.mrf.mxu2 }
  0x9b   :  { %v611_v14 = vadd.f32 %v565_v13, %v443_v10 }
  0x9d   :  { %v631_v15 = vadd.f32 %v1846_v12, %v611_v14 }
  0x9f   :  { %v647_v16 = vmax.f32 %v631_v15, 0.0 }
  0xa0   :  { %v332_v17 = vpop.f32.mrf.mxu0  ;;  %v445_v18 = vpop.f32.mrf.mxu1 }
  0xa1   :  { %663 = vst [vmem:[#allocation2 + $0x8] sm:$0xff] %v647_v16  ;;  %v446_v20 = vadd.f32 %v445_v18, %v332_v17 }
  0xa2   :  { %v568_v21 = vpop.f32.mrf.mxu2 }
  0xa3   :  { %v612_v22 = vadd.f32 %v568_v21, %v446_v20 }
  0xa5   :  { %v632_v23 = vadd.f32 %v1846_v12, %v612_v22 }
  0xa7   :  { %v648_v24 = vmax.f32 %v632_v23, 0.0 }
  0xa8   :  { %v335_v25 = vpop.f32.mrf.mxu0  ;;  %v448_v26 = vpop.f32.mrf.mxu1 }
  0xa9   :  { %664 = vst [vmem:[#allocation2 + $0x10] sm:$0xff] %v648_v24  ;;  %v449_v27 = vadd.f32 %v448_v26, %v335_v25 }
  0xaa   :  { %v571_v28 = vpop.f32.mrf.mxu2 }
  0xab   :  { %v613_v29 = vadd.f32 %v571_v28, %v449_v27 }
  0xad   :  { %v633_v30 = vadd.f32 %v1846_v12, %v613_v29 }
  0xaf   :  { %v649_v31 = vmax.f32 %v633_v30, 0.0 }
  0xb0   :  { %v338_v32 = vpop.f32.mrf.mxu0  ;;  %v451_v33 = vpop.f32.mrf.mxu1 }
  0xb1   :  { %665 = vst [vmem:[#allocation2 + $0x18] sm:$0xff] %v649_v31  ;;  %v452_v34 = vadd.f32 %v451_v33, %v338_v32 }
  0xb2   :  { %v574_v35 = vpop.f32.mrf.mxu2 }
  0xb3   :  { %v614_v36 = vadd.f32 %v574_v35, %v452_v34 }
  0xb5   :  { %v634_v37 = vadd.f32 %v1846_v12, %v614_v36 }
  0xb7   :  { %v650_v39 = vmax.f32 %v634_v37, 0.0 }
  0xb8   :  { %v341_v40 = vpop.f32.mrf.mxu0  ;;  %v454_v41 = vpop.f32.mrf.mxu1 }
  0xb9   :  { %666 = vst [vmem:[#allocation2 + $0x20] sm:$0xff] %v650_v39  ;;  %v455_v43 = vadd.f32 %v454_v41, %v341_v40 }
  0xba   :  { %v577_v44 = vpop.f32.mrf.mxu2 }
  0xbb   :  { %v615_v45 = vadd.f32 %v577_v44, %v455_v43 }
  0xbd   :  { %v635_v46 = vadd.f32 %v1846_v12, %v615_v45 }
  0xbf   :  { %v651_v47 = vmax.f32 %v635_v46, 0.0 }
  0xc0   :  { %v344_v48 = vpop.f32.mrf.mxu0  ;;  %v457_v49 = vpop.f32.mrf.mxu1 }
  0xc1   :  { %667 = vst [vmem:[#allocation2 + $0x28] sm:$0xff] %v651_v47  ;;  %v458_v51 = vadd.f32 %v457_v49, %v344_v48 }
  0xc2   :  { %v580_v52 = vpop.f32.mrf.mxu2 }
  0xc3   :  { %v616_v53 = vadd.f32 %v580_v52, %v458_v51 }
  0xc5   :  { %v636_v55 = vadd.f32 %v1846_v12, %v616_v53 }
  0xc7   :  { %v652_v56 = vmax.f32 %v636_v55, 0.0 }
  0xc8   :  { %v347_v57 = vpop.f32.mrf.mxu0  ;;  %v460_v58 = vpop.f32.mrf.mxu1 }
  0xc9   :  { %668 = vst [vmem:[#allocation2 + $0x30] sm:$0xff] %v652_v56  ;;  %v461_v59 = vadd.f32 %v460_v58, %v347_v57  ;;  %v682_v57 = vld [vmem:[#allocation2 + $0x20] ss:$2 sm:$0xff]  ;;  %v698_v58 = vld [vmem:[#allocation2 + $0x21] ss:$2 sm:$0xff] }
  0xca   :  { %v583_v60 = vpop.f32.mrf.mxu2 }
  0xcb   :  { %v617_v61 = vadd.f32 %v583_v60, %v461_v59 }
  0xcd   :  { %v637_v63 = vadd.f32 %v1846_v12, %v617_v61 }
  0xcf   :  { %v653_v0 = vmax.f32 %v637_v63, 0.0 }
  0xd0   :  { %v350_v1 = vpop.f32.mrf.mxu0  ;;  %v463_v3 = vpop.f32.mrf.mxu1 }
  0xd1   :  { %669 = vst [vmem:[#allocation2 + $0x38] sm:$0xff] %v653_v0  ;;  %v464_v4 = vadd.f32 %v463_v3, %v350_v1  ;;  %v1869_v0 = vmax.f32 %v682_v57, %v698_v58  ;;  %v867_v57 = vld [vmem:[%s2117_s3 + $0x18] sm:$0xff]  ;;  %v866_v58 = vld [vmem:[%s2117_s3 + $0x10] sm:$0xff] }
  0xd2   :  { %v586_v5 = vpop.f32.mrf.mxu2 }
  0xd3   :  { %v618_v6 = vadd.f32 %v586_v5, %v464_v4 }
  0xd5   :  { %v638_v8 = vadd.f32 %v1846_v12, %v618_v6 }
  0xd7   :  { %v654_v9 = vmax.f32 %v638_v8, 0.0 }
  0xd8   :  { %v353_v10 = vpop.f32.mrf.mxu0  ;;  %v466_v13 = vpop.f32.mrf.mxu1 }
  0xd9   :  { %670 = vst [vmem:[#allocation2 + $0x40] sm:$0xff] %v654_v9  ;;  %v467_v14 = vadd.f32 %v466_v13, %v353_v10 }
  0xda   :  { %v589_v15 = vpop.f32.mrf.mxu2 }
  0xdb   :  { %v619_v16 = vadd.f32 %v589_v15, %v467_v14  ;;  %v1402_v15 = vld [vmem:[%s2117_s3 + $0x78] sm:$0xff] }
  0xdc   :  { %1455 = vmatpush.msra.mxu3 %v1402_v15  ;;  %921 = vmatpush.msrb.mxu2 %v1402_v15 }
  0xdd   :  { %v639_v17 = vadd.f32 %v1846_v12, %v619_v16  ;;  %v1401_v16 = vld [vmem:[%s2117_s3 + $0x70] sm:$0xff] }
  0xde   :  { %1456 = vmatpush.msra.mxu3 %v1401_v16  ;;  %922 = vmatpush.msrb.mxu2 %v1401_v16 }
  0xdf   :  { %v655_v18 = vmax.f32 %v639_v17, 0.0 }
  0xe0   :  { %v356_v20 = vpop.f32.mrf.mxu0  ;;  %v469_v21 = vpop.f32.mrf.mxu1 }
  0xe1   :  { %671 = vst [vmem:[#allocation2 + $0x48] sm:$0xff] %v655_v18  ;;  %v470_v22 = vadd.f32 %v469_v21, %v356_v20  ;;  %v1471_v18 = vmov 0.0   ;;  %v1400_v21 = vld [vmem:[%s2117_s3 + $0x68] sm:$0xff] }
  0xe2   :  { %v592_v23 = vpop.f32.mrf.mxu2  ;;  %762 = vst.msk [vmem:[#allocation3 + $0x20] sm:$0xff] %vm757_vm1, %v1471_v18  ;;  %1457 = vmatpush.msra.mxu3 %v1400_v21  ;;  %923 = vmatpush.msrb.mxu2 %v1400_v21 }
  0xe3   :  { %v620_v24 = vadd.f32 %v592_v23, %v470_v22  ;;  %763 = vst.msk [vmem:[#allocation3 + $0x28] sm:$0xff] %vm757_vm1, %v1471_v18 }
  0xe4   :  { %758 = vst.msk [vmem:[#allocation3] sm:$0xff] %vm757_vm1, %v1471_v18 }
  0xe5   :  { %v640_v25 = vadd.f32 %v1846_v12, %v620_v24  ;;  %759 = vst.msk [vmem:[#allocation3 + $0x8] sm:$0xff] %vm757_vm1, %v1471_v18 }
  0xe6   :  { %760 = vst.msk [vmem:[#allocation3 + $0x10] sm:$0xff] %vm757_vm1, %v1471_v18 }
  0xe7   :  { %v656_v26 = vmax.f32 %v640_v25, 0.0  ;;  %761 = vst.msk [vmem:[#allocation3 + $0x18] sm:$0xff] %vm757_vm1, %v1471_v18 }
  0xe8   :  { %v359_v27 = vpop.f32.mrf.mxu0  ;;  %v472_v28 = vpop.f32.mrf.mxu1  ;;  %v686_v29 = vld [vmem:[#allocation2 + $0x40] ss:$2 sm:$0xff]  ;;  %v702_v30 = vld [vmem:[#allocation2 + $0x41] ss:$2 sm:$0xff]  ;;  %764 = vst.msk [vmem:[#allocation3 + $0x30] sm:$0xff] %vm757_vm1, %v1471_v18 }
  0xe9   :  { %672 = vst [vmem:[#allocation2 + $0x50] sm:$0xff] %v656_v26  ;;  %v473_v31 = vadd.f32 %v472_v28, %v359_v27  ;;  %v1858_v32 = vmax.f32 %v686_v29, %v702_v30 }
  0xea   :  { %v595_v33 = vpop.f32.mrf.mxu2  ;;  %765 = vst.msk [vmem:[#allocation3 + $0x38] sm:$0xff] %vm757_vm1, %v1471_v18 }
  0xeb   :  { %v621_v34 = vadd.f32 %v595_v33, %v473_v31  ;;  %733 = vrot.lane.b32.xlu0 %v1858_v32, %s1470_s0  ;;  %v684_v31 = vld [vmem:[#allocation2 + $0x30] ss:$2 sm:$0xff]  ;;  %767 = vst.msk [vmem:[#allocation3 + $0x40] sm:$0x3] %vm766_vm2, %v1471_v18 }
  0xed   :  { %v641_v35 = vadd.f32 %v1846_v12, %v621_v34 }
  0xef   :  { %v657_v36 = vmax.f32 %v641_v35, 0.0  ;;  %v700_v35 = vld [vmem:[#allocation2 + $0x31] ss:$2 sm:$0xff] }
  0xf0   :  { %v362_v37 = vpop.f32.mrf.mxu0  ;;  %v475_v39 = vpop.f32.mrf.mxu1 }
  0xf1   :  { %673 = vst [vmem:[#allocation2 + $0x58] sm:$0xff] %v657_v36  ;;  %v476_v40 = vadd.f32 %v475_v39, %v362_v37  ;;  %v696_v37 = vld [vmem:[#allocation2 + $0x11] ss:$2 sm:$0xff] }
  0xf2   :  { %v598_v41 = vpop.f32.mrf.mxu2 }
  0xf3   :  { %v622_v43 = vadd.f32 %v598_v41, %v476_v40  ;;  %v1399_v40 = vld [vmem:[%s2117_s3 + $0x60] sm:$0xff]  ;;  %v1398_v41 = vld [vmem:[%s2117_s3 + $0x58] sm:$0xff] }
  0xf4   :  { %1458 = vmatpush.msra.mxu3 %v1399_v40  ;;  %924 = vmatpush.msrb.mxu2 %v1399_v40  ;;  %v781_v40 = vand.u32 7, %v1672_v54 }
  0xf5   :  { %v642_v44 = vadd.f32 %v1846_v12, %v622_v43  ;;  %v1397_v43 = vld [vmem:[%s2117_s3 + $0x50] sm:$0xff] }
  0xf6   :  { %1459 = vmatpush.msra.mxu3 %v1398_v41  ;;  %925 = vmatpush.msrb.mxu2 %v1398_v41  ;;  %vm789_vm8 = vcmp.ne.s32.totalorder %v781_v40, 0  ;;  %vm829_vm0 = vcmp.ne.s32.totalorder %v781_v40, 7 }
  0xf7   :  { %v658_v45 = vmax.f32 %v642_v44, 0.0  ;;  %v1396_v44 = vld [vmem:[%s2117_s3 + $0x48] sm:$0xff] }
  0xf8   :  { %v365_v46 = vpop.f32.mrf.mxu0  ;;  %v478_v47 = vpop.f32.mrf.mxu1  ;;  %v688_v48 = vld [vmem:[#allocation2 + $0x50] ss:$2 sm:$0xff]  ;;  %v704_v49 = vld [vmem:[#allocation2 + $0x51] ss:$2 sm:$0xff]  ;;  %1460 = vmatpush.msra.mxu3 %v1397_v43  ;;  %926 = vmatpush.msrb.mxu2 %v1397_v43 }
  0xf9   :  { %674 = vst [vmem:[#allocation2 + $0x60] sm:$0xff] %v658_v45  ;;  %v479_v51 = vadd.f32 %v478_v47, %v365_v46  ;;  %v1864_v52 = vmax.f32 %v688_v48, %v704_v49  ;;  %v1395_v45 = vld [vmem:[%s2117_s3 + $0x40] sm:$0xff]  ;;  %v871_v48 = vld [vmem:[%s2117_s3 + $0x38] sm:$0xff]  ;;  %v870_v49 = vld [vmem:[%s2117_s3 + $0x30] sm:$0xff] }
  0xfa   :  { %v601_v53 = vpop.f32.mrf.mxu2  ;;  %1461 = vmatpush.msra.mxu3 %v1396_v44  ;;  %927 = vmatpush.msrb.mxu2 %v1396_v44  ;;  %v782_v44 = vand.u32 7, %v1693_v62 }
  0xfb   :  { %v623_v55 = vadd.f32 %v601_v53, %v479_v51  ;;  %735 = vrot.lane.b32.xlu0 %v1864_v52, %s1470_s0  ;;  %v869_v53 = vld [vmem:[%s2117_s3 + $0x28] sm:$0xff] }
  0xfc   :  { %1462 = vmatpush.msra.mxu3 %v1395_v45  ;;  %928 = vmatpush.msrb.mxu2 %v1395_v45  ;;  %vm790_vm9 = vcmp.ne.s32.totalorder %v782_v44, 0  ;;  %vm830_vm2 = vcmp.ne.s32.totalorder %v782_v44, 7 }
  0xfd   :  { %v643_v56 = vadd.f32 %v1846_v12, %v623_v55 }
  0xfe   :  { %986 = vmatpush.msrb.mxu3 %v871_v48 }
  0xff   :  { %v659_v59 = vmax.f32 %v643_v56, 0.0 }
 0x100   :  { %v368_v60 = vpop.f32.mrf.mxu0  ;;  %v481_v61 = vpop.f32.mrf.mxu1  ;;  %987 = vmatpush.msrb.mxu3 %v870_v49 }
 0x101   :  { %675 = vst [vmem:[#allocation2 + $0x68] sm:$0xff] %v659_v59  ;;  %v482_v63 = vadd.f32 %v481_v61, %v368_v60 }
 0x102   :  { %v604_v1 = vpop.f32.mrf.mxu2  ;;  %988 = vmatpush.msrb.mxu3 %v869_v53 }
 0x103   :  { %v624_v3 = vadd.f32 %v604_v1, %v482_v63  ;;  %729 = vrot.lane.b32.xlu0 %v1869_v0, %s1470_s0  ;;  %v864_v63 = vld [vmem:[%s2117_s3] sm:$0xff] }
 0x105   :  { %v644_v4 = vadd.f32 %v1846_v12, %v624_v3 }
 0x107   :  { %v660_v5 = vmax.f32 %v644_v4, 0.0 }
 0x108   :  { %v371_v6 = vpop.f32.mrf.mxu0  ;;  %v484_v8 = vpop.f32.mrf.mxu1  ;;  %v690_v9 = vld [vmem:[#allocation2 + $0x60] ss:$2 sm:$0xff]  ;;  %v706_v10 = vld [vmem:[#allocation2 + $0x61] ss:$2 sm:$0xff] }
 0x109   :  { %676 = vst [vmem:[#allocation2 + $0x70] sm:$0xff] %v660_v5  ;;  %v485_v13 = vadd.f32 %v484_v8, %v371_v6  ;;  %v1874_v14 = vmax.f32 %v690_v9, %v706_v10  ;;  %v1426_v5 = vld [vmem:[%s2117_s3 + $0xb8] sm:$0xff] }
 0x10a   :  { %v607_v17 = vpop.f32.mrf.mxu2 }
 0x10b   :  { %v625_v20 = vadd.f32 %v607_v17, %v485_v13  ;;  %737 = vrot.lane.b32.xlu1 %v1874_v14, %s1470_s0  ;;  %v1425_v13 = vld [vmem:[%s2117_s3 + $0xb0] sm:$0xff]  ;;  %v1424_v17 = vld [vmem:[%s2117_s3 + $0xa8] sm:$0xff] }
 0x10d   :  { %v645_v22 = vadd.f32 %v1846_v12, %v625_v20 }
 0x10f   :  { %v661_v23 = vmax.f32 %v645_v22, 0.0 }
 0x110   :  { %v562_v24 = vpop.f32.mrf.mxu0 }
 0x111   :  { %677 = vst [vmem:[#allocation2 + $0x78] sm:$0xff] %v661_v23  ;;  %v610_v25 = vadd.f32 %v562_v24, %v1840_v7  ;;  %v1911_v7 = vmax.f32 %v684_v31, %v700_v35  ;;  %v776_v23 = vand.u32 7, %v1553_v11  ;;  %v1423_v24 = vld [vmem:[%s2117_s3 + $0xa0] sm:$0xff]  ;;  %v778_v31 = vand.u32 7, %v1629_v38 }
 0x112   :  { %v779_v35 = vand.u32 7, %v1640_v42 }
 0x113   :  { %v630_v26 = vadd.f32 %v1846_v12, %v610_v25  ;;  %v680_v12 = vld [vmem:[#allocation2 + $0x10] ss:$2 sm:$0xff]  ;;  %vm784_vm3 = vcmp.ne.s32.totalorder %v776_v23, 0  ;;  %vm786_vm5 = vcmp.ne.s32.totalorder %v778_v31, 0  ;;  %vm824_vm11 = vcmp.ne.s32.totalorder %v776_v23, 7 }
 0x114   :  { %v710_v39 = vmax.f32 %v680_v12, %v696_v37  ;;  %vm787_vm6 = vcmp.ne.s32.totalorder %v779_v35, 0  ;;  %v1419_v12 = vld [vmem:[%s2117_s3 + $0x80] sm:$0xff]  ;;  %v780_v37 = vand.u32 7, %v1661_v50  ;;  %v783_v50 = vand.u32 7, %v1704_v2 }
 0x115   :  { %v646_v27 = vmax.f32 %v630_v26, 0.0  ;;  %vm826_vm13 = vcmp.ne.s32.totalorder %v778_v31, 7  ;;  %vm827_vm14 = vcmp.ne.s32.totalorder %v779_v35, 7 }
 0x116   :  { %vm788_vm7 = vcmp.ne.s32.totalorder %v780_v37, 0  ;;  %vm791_vm10 = vcmp.ne.s32.totalorder %v783_v50, 0  ;;  %vm828_vm15 = vcmp.ne.s32.totalorder %v780_v37, 7  ;;  %v1176_v37 = vld [vmem:[%s2119_s5 + $0x8] sm:$0xff] }
 0x117   :  { %662 = vst [vmem:[#allocation2] sm:$0xff] %v646_v27  ;;  %1222 = vmatpush.msrb.mxu1 %v1176_v37 }
 0x118   :  { %v692_v28 = vld [vmem:[#allocation2 + $0x70] ss:$2 sm:$0xff]  ;;  %v708_v29 = vld [vmem:[#allocation2 + $0x71] ss:$2 sm:$0xff] }
 0x119   :  { %v1906_v30 = vmax.f32 %v692_v28, %v708_v29  ;;  %v777_v28 = vand.u32 7, %v1575_v19  ;;  %v1422_v29 = vld [vmem:[%s2117_s3 + $0x98] sm:$0xff] }
 0x11b   :  { %739 = vrot.lane.b32.xlu1 %v1906_v30, %s1470_s0  ;;  %vm785_vm4 = vcmp.ne.s32.totalorder %v777_v28, 0  ;;  %vm825_vm12 = vcmp.ne.s32.totalorder %v777_v28, 7 }
 0x11e   :  { %v678_v33 = vld [vmem:[#allocation2] ss:$2 sm:$0xff]  ;;  %v694_v34 = vld [vmem:[#allocation2 + $0x1] ss:$2 sm:$0xff] }
 0x11f   :  { %v709_v36 = vmax.f32 %v678_v33, %v694_v34  ;;  %v1421_v33 = vld [vmem:[%s2117_s3 + $0x90] sm:$0xff] }
 0x121   :  { %725 = vrot.lane.b32.xlu2 %v709_v36, %s1470_s0 }
 0x123   :  { %731 = vrot.lane.b32.xlu1 %v1911_v7, %s1470_s0 }
 0x129   :  { %727 = vrot.lane.b32.xlu2 %v710_v39, %s1470_s0 }
 0x15d   :  { %v734_v46 = vpop.permute.xlu0 %733 }
 0x15e   :  { %v753_v47 = vmax.f32 %v1858_v32, %v734_v46  ;;  %v868_v32 = vld [vmem:[%s2117_s3 + $0x20] sm:$0xff] }
 0x15f   :  { %989 = vmatpush.msrb.mxu3 %v868_v32 }
 0x160   :  { %772 = vst.msk [vmem:[#allocation3 + $0x21] sm:$0xff] %vm757_vm1, %v753_v47 }
 0x161   :  { %990 = vmatpush.msrb.mxu3 %v867_v57 }
 0x163   :  { %991 = vmatpush.msrb.mxu3 %v866_v58 }
 0x167   :  { %v876_v51 = vld [vmem:[#allocation3 + $0x21] sm:$0xff] }
 0x168   :  { %1407 = vmatmul.msk.f32.vlgmr.msra.gmra.mxu3 %vm757_vm1, %v876_v51 }
 0x16d   :  { %v736_v55 = vpop.permute.xlu0 %735 }
 0x16e   :  { %v754_v56 = vmax.f32 %v1864_v52, %v736_v55  ;;  %v865_v52 = vld [vmem:[%s2117_s3 + $0x8] sm:$0xff] }
 0x16f   :  { %992 = vmatpush.msrb.mxu3 %v865_v52 }
 0x170   :  { %773 = vst.msk [vmem:[#allocation3 + $0x29] sm:$0xff] %vm757_vm1, %v754_v56 }
 0x171   :  { %993 = vmatpush.msrb.mxu3 %v864_v63 }
 0x173   :  { %1060 = vmatpush.msra.mxu3 %v1426_v5 }
 0x175   :  { %v730_v59 = vpop.permute.xlu0 %729  ;;  %1061 = vmatpush.msra.mxu3 %v1425_v13 }
 0x176   :  { %v751_v60 = vmax.f32 %v1869_v0, %v730_v59 }
 0x177   :  { %v877_v61 = vld [vmem:[#allocation3 + $0x29] sm:$0xff]  ;;  %1062 = vmatpush.msra.mxu3 %v1424_v17 }
 0x178   :  { %770 = vst.msk [vmem:[#allocation3 + $0x11] sm:$0xff] %vm757_vm1, %v751_v60  ;;  %1408 = vmatmul.msk.f32.gmra.mxu3 %vm757_vm1, %v877_v61  ;;  %v797_v41 = vld [vmem:[#allocation3 + $0x28] sm:$0xff] }
 0x179   :  { %1063 = vmatpush.msra.mxu3 %v1423_v24  ;;  %v821_v43 = vsel %vm789_vm8, %v797_v41, 0.0  ;;  %v836_v56 = vld [vmem:[#allocation3 + $0x22] sm:$0xff] }
 0x17a   :  { %v860_v57 = vsel %vm828_vm15, %v836_v56, 0.0 }
 0x17b   :  { %v726_v1 = vpop.permute.xlu2 %725  ;;  %1064 = vmatpush.msra.mxu3 %v1422_v29 }
 0x17c   :  { %v749_v3 = vmax.f32 %v709_v36, %v726_v1  ;;  %v1420_v36 = vld [vmem:[%s2117_s3 + $0x88] sm:$0xff] }
 0x17d   :  { %v738_v4 = vpop.permute.xlu1 %737  ;;  %1065 = vmatpush.msra.mxu3 %v1421_v33 }
 0x17e   :  { %768 = vst.msk [vmem:[#allocation3 + $0x1] sm:$0xff] %vm757_vm1, %v749_v3  ;;  %v755_v0 = vmax.f32 %v1874_v14, %v738_v4 }
 0x17f   :  { %v874_v20 = vld [vmem:[#allocation3 + $0x11] sm:$0xff]  ;;  %1066 = vmatpush.msra.mxu3 %v1420_v36 }
 0x180   :  { %774 = vst.msk [vmem:[#allocation3 + $0x31] sm:$0xff] %vm757_vm1, %v755_v0 }
 0x181   :  { %1067 = vmatpush.msra.mxu3 %v1419_v12 }
 0x183   :  { %v728_v6 = vpop.permute.xlu2 %727 }
 0x184   :  { %v750_v8 = vmax.f32 %v710_v39, %v728_v6 }
 0x185   :  { %v872_v9 = vld [vmem:[#allocation3 + $0x1] sm:$0xff] }
 0x186   :  { %769 = vst.msk [vmem:[#allocation3 + $0x9] sm:$0xff] %vm757_vm1, %v750_v8  ;;  %1403 = vmatmul.msk.f32.vlgmr.msrb.gmra.mxu2 %vm757_vm1, %v872_v9  ;;  %v792_v25 = vld [vmem:[#allocation3] sm:$0xff] }
 0x187   :  { %v878_v10 = vld [vmem:[#allocation3 + $0x31] sm:$0xff]  ;;  %v816_v27 = vsel %vm784_vm3, %v792_v25, 0.0  ;;  %vm831_vm3 = vcmp.ne.s32.totalorder %v783_v50, 7 }
 0x188   :  { %1409 = vmatmul.msk.f32.gmra.mxu3 %vm757_vm1, %v878_v10  ;;  %v798_v45 = vld [vmem:[#allocation3 + $0x30] sm:$0xff] }
 0x189   :  { %v822_v46 = vsel %vm790_vm9, %v798_v45, 0.0  ;;  %v837_v59 = vld [vmem:[#allocation3 + $0x2a] sm:$0xff] }
 0x18a   :  { %v861_v60 = vsel %vm829_vm0, %v837_v59, 0.0 }
 0x18d   :  { %v740_v14 = vpop.permute.xlu1 %739  ;;  %v873_v15 = vld [vmem:[#allocation3 + $0x9] sm:$0xff] }
 0x18e   :  { %v756_v16 = vmax.f32 %v1906_v30, %v740_v14  ;;  %1404 = vmatmul.msk.f32.gmra.mxu2 %vm757_vm1, %v873_v15  ;;  %v793_v11 = vld [vmem:[#allocation3 + $0x8] sm:$0xff]  ;;  %v794_v34 = vld [vmem:[#allocation3 + $0x10] sm:$0xff] }
 0x18f   :  { %v817_v30 = vsel %vm785_vm4, %v793_v11, 0.0  ;;  %v818_v19 = vsel %vm786_vm5, %v794_v34, 0.0  ;;  %v832_v54 = vld [vmem:[#allocation3 + $0x2] sm:$0xff]  ;;  %v833_v51 = vld [vmem:[#allocation3 + $0xa] sm:$0xff]  ;;  %vm1169_vm4 = vcmask 130048   ;;  %vm1323_vm5 = vcmask 80896  }
 0x190   :  { %775 = vst.msk [vmem:[#allocation3 + $0x39] sm:$0xff] %vm757_vm1, %v756_v16  ;;  %v856_v49 = vsel %vm824_vm11, %v832_v54, 0.0  ;;  %v857_v62 = vsel %vm825_vm12, %v833_v51, 0.0 }
 0x195   :  { %v732_v18 = vpop.permute.xlu1 %731 }
 0x196   :  { %v752_v21 = vmax.f32 %v1911_v7, %v732_v18  ;;  %1405 = vmatmul.msk.f32.gmra.mxu2 %vm757_vm1, %v874_v20  ;;  %v2035_v18 = vld [vmem:[%s2118_s4] ss:$0 sm:$0xff] }
 0x197   :  { %v879_v22 = vld [vmem:[#allocation3 + $0x39] sm:$0xff] }
 0x198   :  { %771 = vst.msk [vmem:[#allocation3 + $0x19] sm:$0xff] %vm757_vm1, %v752_v21  ;;  %1410 = vmatmul.msk.f32.gmra.mxu3 %vm757_vm1, %v879_v22  ;;  %v799_v47 = vld [vmem:[#allocation3 + $0x38] sm:$0xff] }
 0x199   :  { %v823_v48 = vsel %vm791_vm10, %v799_v47, 0.0  ;;  %v838_v52 = vld [vmem:[#allocation3 + $0x32] sm:$0xff]  ;;  %v839_v3 = vld [vmem:[#allocation3 + $0x3a] sm:$0xff] }
 0x19a   :  { %v862_v63 = vsel %vm830_vm2, %v838_v52, 0.0  ;;  %v863_v4 = vsel %vm831_vm3, %v839_v3, 0.0 }
 0x19f   :  { %v875_v26 = vld [vmem:[#allocation3 + $0x19] sm:$0xff] }
 0x1a0   :  { %1406 = vmatmul.msk.f32.gmra.mxu2 %vm757_vm1, %v875_v26  ;;  %1411 = vmatmul.msk.f32.vlgmr.msrb.gmra.mxu3 %vm757_vm1, %v816_v27  ;;  %v795_v7 = vld [vmem:[#allocation3 + $0x18] sm:$0xff]  ;;  %v796_v39 = vld [vmem:[#allocation3 + $0x20] sm:$0xff] }
 0x1a1   :  { %v819_v38 = vsel %vm787_vm6, %v795_v7, 0.0  ;;  %v820_v42 = vsel %vm788_vm7, %v796_v39, 0.0  ;;  %v834_v53 = vld [vmem:[#allocation3 + $0x12] sm:$0xff]  ;;  %v835_v2 = vld [vmem:[#allocation3 + $0x1a] sm:$0xff] }
 0x1a2   :  { %v858_v32 = vsel %vm826_vm13, %v834_v53, 0.0  ;;  %v859_v55 = vsel %vm827_vm14, %v835_v2, 0.0 }
 0x1a8   :  { %1412 = vmatmul.msk.f32.gmra.mxu3 %vm757_vm1, %v817_v30 }
 0x1b0   :  { %1413 = vmatmul.msk.f32.gmra.mxu3 %vm757_vm1, %v818_v19 }
 0x1b8   :  { %1414 = vmatmul.msk.f32.gmra.mxu3 %vm757_vm1, %v819_v38 }
 0x1c0   :  { %1415 = vmatmul.msk.f32.gmra.mxu3 %vm757_vm1, %v820_v42 }
 0x1c8   :  { %1416 = vmatmul.msk.f32.gmra.mxu3 %vm757_vm1, %v821_v43 }
 0x1d0   :  { %1417 = vmatmul.msk.f32.gmra.mxu3 %vm757_vm1, %v822_v46 }
 0x1d8   :  { %1418 = vmatmul.msk.f32.gmra.mxu3 %vm757_vm1, %v823_v48 }
 0x1e0   :  { %1427 = vmatmul.msk.f32.vlgmr.msra.gmra.mxu3 %vm757_vm1, %v856_v49 }
 0x1e8   :  { %1428 = vmatmul.msk.f32.gmra.mxu3 %vm757_vm1, %v857_v62 }
 0x1eb   :  { %v942_v58 = vpop.f32.mrf.mxu3 }
 0x1f0   :  { %1429 = vmatmul.msk.f32.gmra.mxu3 %vm757_vm1, %v858_v32 }
 0x1f8   :  { %1430 = vmatmul.msk.f32.gmra.mxu3 %vm757_vm1, %v859_v55 }
 0x1fb   :  { %v2024_v61 = vpop.f32.mrf.mxu3 }
 0x200   :  { %1431 = vmatmul.msk.f32.gmra.mxu3 %vm757_vm1, %v860_v57 }
 0x208   :  { %1432 = vmatmul.msk.f32.gmra.mxu3 %vm757_vm1, %v861_v60 }
 0x209   :  { %v930_v16 = vpop.f32.mrf.mxu2 }
 0x20b   :  { %v2027_v1 = vpop.f32.mrf.mxu3 }
 0x210   :  { %1433 = vmatmul.msk.f32.gmra.mxu3 %vm757_vm1, %v862_v63 }
 0x211   :  { %v933_v23 = vpop.f32.mrf.mxu2 }
 0x218   :  { %1434 = vmatmul.msk.f32.gmra.mxu3 %vm757_vm1, %v863_v4  ;;  %vm1121_vm1 = vcmask 261120  }
 0x219   :  { %v936_v11 = vpop.f32.mrf.mxu2 }
 0x21b   :  { %v2030_v0 = vpop.f32.mrf.mxu3 }
 0x223   :  { %v995_v5 = vpop.f32.mrf.mxu3  ;;  %v939_v35 = vpop.f32.mrf.mxu2 }
 0x224   :  { %v996_v17 = vadd.f32 %v995_v5, %v930_v16  ;;  %v1443_v16 = vld [vmem:[%s2119_s5 + $0x38] sm:$0xff] }
 0x22b   :  { %v998_v6 = vpop.f32.mrf.mxu3 }
 0x22c   :  { %v999_v25 = vadd.f32 %v998_v6, %v933_v23 }
 0x233   :  { %v1001_v8 = vpop.f32.mrf.mxu3 }
 0x234   :  { %v1002_v30 = vadd.f32 %v1001_v8, %v936_v11  ;;  %v1295_v11 = vld [vmem:[%s2122_s7 + $0x18] sm:$0xff] }
 0x23b   :  { %v1004_v9 = vpop.f32.mrf.mxu3 }
 0x23c   :  { %v1005_v38 = vadd.f32 %v1004_v9, %v939_v35 }
 0x243   :  { %v1007_v10 = vpop.f32.mrf.mxu3 }
 0x244   :  { %v1008_v43 = vadd.f32 %v1007_v10, %v942_v58 }
 0x24b   :  { %v1010_v13 = vpop.f32.mrf.mxu3 }
 0x24c   :  { %v1011_v54 = vadd.f32 %v1010_v13, %v2024_v61  ;;  %v1436_v13 = vld [vmem:[%s2119_s5 + $0x18] sm:$0xff] }
 0x24d   :  { %1199 = vmatpush.msra.mxu0 %v1436_v13 }
 0x253   :  { %v1013_v14 = vpop.f32.mrf.mxu3 }
 0x254   :  { %v1014_v2 = vadd.f32 %v1013_v14, %v2027_v1  ;;  %v1435_v14 = vld [vmem:[%s2119_s5 + $0x10] sm:$0xff] }
 0x255   :  { %1200 = vmatpush.msra.mxu0 %v1435_v14 }
 0x257   :  { %1279 = vmatpush.msrb.mxu0 %v1443_v16 }
 0x25b   :  { %v1016_v15 = vpop.f32.mrf.mxu3 }
 0x25c   :  { %v1017_v61 = vadd.f32 %v1016_v15, %v2030_v0  ;;  %v1175_v0 = vld [vmem:[%s2119_s5] sm:$0xff]  ;;  %v1440_v15 = vld [vmem:[%s2119_s5 + $0x28] sm:$0xff] }
 0x25d   :  { %1223 = vmatpush.msrb.mxu1 %v1175_v0 }
 0x25f   :  { %1250 = vmatpush.msra.mxu1 %v1440_v15 }
 0x263   :  { %v1069_v20 = vpop.f32.mrf.mxu3 }
 0x264   :  { %v1093_v21 = vadd.f32 %v1069_v20, %v996_v17  ;;  %v1439_v17 = vld [vmem:[%s2119_s5 + $0x20] sm:$0xff] }
 0x265   :  { %1251 = vmatpush.msra.mxu1 %v1439_v17 }
 0x266   :  { %v1105_v22 = vadd.f32 %v2035_v18, %v1093_v21 }
 0x268   :  { %v1113_v24 = vmax.f32 %v1105_v22, 0.0 }
 0x26a   :  { %1122 = vst.msk [vmem:[#allocation4] sm:$0xff] %vm1121_vm1, %v1113_v24 }
 0x26b   :  { %v1072_v26 = vpop.f32.mrf.mxu3 }
 0x26c   :  { %v1094_v27 = vadd.f32 %v1072_v26, %v999_v25 }
 0x26e   :  { %v1106_v28 = vadd.f32 %v2035_v18, %v1094_v27 }
 0x270   :  { %v1114_v29 = vmax.f32 %v1106_v28, 0.0 }
 0x272   :  { %1123 = vst.msk [vmem:[#allocation4 + $0x8] sm:$0xff] %vm1121_vm1, %v1114_v29 }
 0x273   :  { %v1075_v31 = vpop.f32.mrf.mxu3 }
 0x274   :  { %v1095_v33 = vadd.f32 %v1075_v31, %v1002_v30  ;;  %v1294_v30 = vld [vmem:[%s2122_s7 + $0x10] sm:$0xff]  ;;  %v1293_v31 = vld [vmem:[%s2122_s7 + $0x8] sm:$0xff] }
 0x276   :  { %v1107_v34 = vadd.f32 %v2035_v18, %v1095_v33  ;;  %v1292_v33 = vld [vmem:[%s2122_s7] sm:$0xff] }
 0x278   :  { %v1115_v19 = vmax.f32 %v1107_v34, 0.0 }
 0x279   :  { %v1130_v36 = vld [vmem:[#allocation4] ss:$2 sm:$0xff]  ;;  %v1138_v7 = vld [vmem:[#allocation4 + $0x1] ss:$2 sm:$0xff] }
 0x27a   :  { %1124 = vst.msk [vmem:[#allocation4 + $0x10] sm:$0xff] %vm1121_vm1, %v1115_v19  ;;  %v1145_v12 = vmax.f32 %v1130_v36, %v1138_v7 }
 0x27b   :  { %v1078_v39 = vpop.f32.mrf.mxu3 }
 0x27c   :  { %v1096_v42 = vadd.f32 %v1078_v39, %v1005_v38  ;;  %1153 = vrot.lane.b32.xlu2 %v1145_v12, %s1472_s10  ;;  %v1468_v38 = vld [vmem:[%s2120_s6] ss:$0 sm:$0xff] }
 0x27e   :  { %v1108_v40 = vadd.f32 %v2035_v18, %v1096_v42 }
 0x280   :  { %v1116_v41 = vmax.f32 %v1108_v40, 0.0  ;;  %v1469_v40 = vld [vmem:[%s2121_s8] ss:$0 sm:$0xff] }
 0x282   :  { %1125 = vst.msk [vmem:[#allocation4 + $0x18] sm:$0xff] %vm1121_vm1, %v1116_v41 }
 0x283   :  { %v1081_v44 = vpop.f32.mrf.mxu3 }
 0x284   :  { %v1097_v45 = vadd.f32 %v1081_v44, %v1008_v43 }
 0x286   :  { %v1109_v46 = vadd.f32 %v2035_v18, %v1097_v45 }
 0x288   :  { %v1117_v50 = vmax.f32 %v1109_v46, 0.0 }
 0x289   :  { %v1132_v47 = vld [vmem:[#allocation4 + $0x10] ss:$2 sm:$0xff]  ;;  %v1140_v48 = vld [vmem:[#allocation4 + $0x11] ss:$2 sm:$0xff] }
 0x28a   :  { %1126 = vst.msk [vmem:[#allocation4 + $0x20] sm:$0xff] %vm1121_vm1, %v1117_v50  ;;  %v1146_v49 = vmax.f32 %v1132_v47, %v1140_v48 }
 0x28b   :  { %v1084_v51 = vpop.f32.mrf.mxu3 }
 0x28c   :  { %v1098_v62 = vadd.f32 %v1084_v51, %v1011_v54  ;;  %1155 = vrot.lane.b32.xlu0 %v1146_v49, %s1472_s10 }
 0x28e   :  { %v1110_v53 = vadd.f32 %v2035_v18, %v1098_v62 }
 0x290   :  { %v1118_v32 = vmax.f32 %v1110_v53, 0.0 }
 0x292   :  { %1127 = vst.msk [vmem:[#allocation4 + $0x28] sm:$0xff] %vm1121_vm1, %v1118_v32 }
 0x293   :  { %v1087_v55 = vpop.f32.mrf.mxu3 }
 0x294   :  { %v1099_v56 = vadd.f32 %v1087_v55, %v1014_v2 }
 0x296   :  { %v1111_v57 = vadd.f32 %v2035_v18, %v1099_v56 }
 0x298   :  { %v1119_v58 = vmax.f32 %v1111_v57, 0.0 }
 0x299   :  { %v1134_v59 = vld [vmem:[#allocation4 + $0x20] ss:$2 sm:$0xff]  ;;  %v1142_v60 = vld [vmem:[#allocation4 + $0x21] ss:$2 sm:$0xff] }
 0x29a   :  { %1128 = vst.msk [vmem:[#allocation4 + $0x30] sm:$0xff] %vm1121_vm1, %v1119_v58  ;;  %v1147_v52 = vmax.f32 %v1134_v59, %v1142_v60 }
 0x29b   :  { %v1090_v63 = vpop.f32.mrf.mxu3 }
 0x29c   :  { %v1100_v3 = vadd.f32 %v1090_v63, %v1017_v61  ;;  %1157 = vrot.lane.b32.xlu1 %v1147_v52, %s1472_s10 }
 0x29e   :  { %v1112_v1 = vadd.f32 %v2035_v18, %v1100_v3  ;;  %v1442_v18 = vld [vmem:[%s2119_s5 + $0x30] sm:$0xff] }
 0x29f   :  { %1280 = vmatpush.msrb.mxu0 %v1442_v18 }
 0x2a0   :  { %v1120_v4 = vmax.f32 %v1112_v1, 0.0 }
 0x2a2   :  { %1129 = vst.msk [vmem:[#allocation4 + $0x38] sm:$0xff] %vm1121_vm1, %v1120_v4 }
 0x2a9   :  { %v1136_v5 = vld [vmem:[#allocation4 + $0x30] ss:$2 sm:$0xff]  ;;  %v1144_v6 = vld [vmem:[#allocation4 + $0x31] ss:$2 sm:$0xff] }
 0x2aa   :  { %v1148_v8 = vmax.f32 %v1136_v5, %v1144_v6 }
 0x2ac   :  { %1159 = vrot.lane.b32.xlu2 %v1148_v8, %s1472_s10 }
 0x2d6   :  { %v1154_v9 = vpop.permute.xlu2 %1153 }
 0x2d7   :  { %v1165_v10 = vmax.f32 %v1145_v12, %v1154_v9 }
 0x2d9   :  { %1170 = vst.msk [vmem:[#allocation5] sm:$0xff] %vm1169_vm4, %v1165_v10 }
 0x2fe   :  { %v1156_v20 = vpop.permute.xlu0 %1155 }
 0x2ff   :  { %v1166_v21 = vmax.f32 %v1146_v49, %v1156_v20 }
 0x301   :  { %1171 = vst.msk [vmem:[#allocation5 + $0x8] sm:$0xff] %vm1169_vm4, %v1166_v21 }
 0x306   :  { %v1160_v22 = vpop.permute.xlu2 %1159 }
 0x307   :  { %v1168_v23 = vmax.f32 %v1148_v8, %v1160_v22 }
 0x309   :  { %1173 = vst.msk [vmem:[#allocation5 + $0x18] sm:$0xff] %vm1169_vm4, %v1168_v23 }
 0x30e   :  { %v1158_v24 = vpop.permute.xlu1 %1157 }
 0x30f   :  { %v1167_v25 = vmax.f32 %v1147_v52, %v1158_v24 }
 0x311   :  { %1172 = vst.msk [vmem:[#allocation5 + $0x10] sm:$0xff] %vm1169_vm4, %v1167_v25 }
 0x318   :  { %v1178_v26 = vld [vmem:[#allocation5 + $0x1] ss:$4 sm:$0xff]  ;;  %v1174_v27 = vld [vmem:[#allocation5] ss:$4 sm:$0xff]  ;;  %v1229_v28 = vld [vmem:[#allocation5 + $0x2] ss:$4 sm:$0xff] }
 0x319   :  { %1437 = vmatmul.msk.f32.vlgmr.msra.gmra.mxu0 %vm1169_vm4, %v1178_v26  ;;  %1438 = vmatmul.msk.f32.vlgmr.msrb.gmra.mxu1 %vm1169_vm4, %v1174_v27  ;;  %v1258_v29 = vld [vmem:[#allocation5 + $0x3] ss:$4 sm:$0xff] }
 0x31a   :  { %1315 = vmatpush.msrb.mxu1 %v1295_v11 }
 0x31c   :  { %1316 = vmatpush.msrb.mxu1 %v1294_v30 }
 0x31e   :  { %1317 = vmatpush.msrb.mxu1 %v1293_v31 }
 0x320   :  { %1318 = vmatpush.msrb.mxu1 %v1292_v33 }
 0x321   :  { %1441 = vmatmul.msk.f32.vlgmr.msra.gmra.mxu1 %vm1169_vm4, %v1229_v28  ;;  %1444 = vmatmul.msk.f32.vlgmr.msrb.gmra.mxu0 %vm1169_vm4, %v1258_v29 }
 0x396   :  { %v1202_v34 = vpop.f32.mrf.mxu0  ;;  %v1225_v19 = vpop.f32.mrf.mxu1 }
 0x397   :  { %v1226_v35 = vadd.f32 %v1225_v19, %v1202_v34 }
 0x39e   :  { %v1253_v36 = vpop.f32.mrf.mxu1  ;;  %v1282_v12 = vpop.f32.mrf.mxu0 }
 0x39f   :  { %v1256_v7 = vadd.f32 %v1253_v36, %v1226_v35 }
 0x3a1   :  { %v1285_v37 = vadd.f32 %v1282_v12, %v1256_v7 }
 0x3a3   :  { %v1290_v39 = vadd.f32 %v1468_v38, %v1285_v37 }
 0x3a5   :  { %v1291_v42 = vmax.f32 %v1290_v39, 0.0 }
 0x3a7   :  { %1445 = vmatmul.msk.f32.vlgmr.msrb.gmra.mxu1 %vm1121_vm1, %v1291_v42 }
 0x424   :  { %v1320_v41 = vpop.f32.mrf.mxu1 }
 0x425   :  { %v1321_v43 = vadd.f32 %v1469_v40, %v1320_v41 }
 0x427   :  { %1324 = vst.msk [vmem:[%s2123_s9] sm:$0xff] %vm1323_vm5, %v1321_v43 }

</bundles_post_ra>
